<compile_context>
chip_gen: v5e
topology: v5e:2x2
jax: 0.10.0
libtpu: 0.0.40
codegen_flags: <defaults>
</compile_context>

<pallas_src>
import functools

import jax
import jax.numpy as jnp
from jax.experimental import pallas as pl
from jax.experimental.pallas import tpu as pltpu


# ---------------------------------------------------------------------------
# Pallas kernel: single invocation, fully unrolled time recurrence.
# ---------------------------------------------------------------------------
def _lstmi_kernel(x2d_ref,                        # (S*B, C)  time-major, flattened
                  w_ih0_ref, b0_ref,              # layer-0 input proj (C,4H),(1,4H)
                  w_cat_ref,                      # (H, 8H) = [W_ih1^T | W_hh0^T]
                  w_hh1_ref, b1_ref,              # layer-1 recurrent (H,4H),(1,4H)
                  fc1_w_ref, fc1_b_ref,
                  fc2_w_ref, fc2_b_ref,
                  out_ref,
                  *, seq_len, batch, hidden_size):
    S, B, H = seq_len, batch, hidden_size

    # Sequence-wide layer-0 input projection: one (S*B, C) @ (C, 4H) matmul,
    # bias folded in.  Removes one matmul + bias add from every step's chain.
    xproj = (jnp.dot(x2d_ref[...], w_ih0_ref[...],
                     preferred_element_type=jnp.float32)
             + b0_ref[...])                                   # (S*B, 4H)

    w_cat = w_cat_ref[...]          # (H, 8H): [:, :4H]=W_ih1^T, [:, 4H:]=W_hh0^T
    w_hh1 = w_hh1_ref[...]          # (H, 4H)
    # Hoisted bias broadcast (JAX does not CSE broadcast_in_dim inside the
    # unrolled loop).
    b1_b = jnp.broadcast_to(b1_ref[...], (B, 4 * H))          # (B, 4H)

    def activate(gates, c_prev=None):
        # Full-width transcendentals (2 EUP pushes), then extract the i/f/g/o
        # quarters.  PyTorch gate order is [i, f, g, o].
        sig = jax.nn.sigmoid(gates)                           # (B, 4H)
        th = jnp.tanh(gates)                                  # (B, 4H)
        i_g = sig[:, 0:H]
        f_g = sig[:, H:2 * H]
        g_g = th[:, 2 * H:3 * H]
        o_g = sig[:, 3 * H:4 * H]
        if c_prev is None:                                    # peeled t=0: c_prev == 0
            c_new = i_g * g_g
        else:
            c_new = f_g * c_prev + i_g * g_g
        h_new = o_g * jnp.tanh(c_new)
        return h_new, c_new

    # ---- t = 0 peeled: all states are zero, skip recurrent matmuls & f*c ----
    h1, c1 = activate(xproj[0:B, :])                          # layer 0, no h1@W_hh0
    # Fused h1-consuming matmul: layer-1(0) input proj + layer-0(1) recurrent.
    h1proj = jnp.dot(h1, w_cat, preferred_element_type=jnp.float32)   # (B, 8H)
    rec0_next = h1proj[:, 4 * H:8 * H]                        # h1(0) @ W_hh0^T
    h2, c2 = activate(h1proj[:, 0:4 * H] + b1_b)              # layer 1, no h2@W_hh1

    # ---- remaining steps: static (fully unrolled) loop, single basic block ----
    for t in range(1, S):
        # Layer-1 recurrent partial: depends only on h2(t-1) -> off the serial
        # h1 critical path, scheduler can overlap it with layer 0 of step t.
        hh1_part = (jnp.dot(h2, w_hh1, preferred_element_type=jnp.float32)
                    + b1_b)                                   # (B, 4H)

        # Layer 0: precomputed input projection + stashed recurrent term.
        gates0 = xproj[t * B:(t + 1) * B, :] + rec0_next
        h1, c1 = activate(gates0, c1)

        # Single fused (B, H) @ (H, 8H) dot for both h1(t) consumers.
        h1proj = jnp.dot(h1, w_cat, preferred_element_type=jnp.float32)
        rec0_next = h1proj[:, 4 * H:8 * H]                    # for step t+1

        # Layer 1 (nn.LSTM inter-layer dropout p=0.2 is identity in eval mode).
        h2, c2 = activate(h1proj[:, 0:4 * H] + hh1_part, c2)

    # Classifier head on the last hidden state of layer 1.
    z = jnp.dot(h2, fc1_w_ref[...], preferred_element_type=jnp.float32) + fc1_b_ref[...]
    z = jnp.maximum(z, 0.0)                                   # F.relu
    # self.dropout (p=0.2) is identity in eval mode.
    logits = jnp.dot(z, fc2_w_ref[...], preferred_element_type=jnp.float32) + fc2_b_ref[...]
    out_ref[...] = logits.astype(out_ref.dtype)


# ---------------------------------------------------------------------------
# Wrapper
# ---------------------------------------------------------------------------
def lstmi_forward(x, params, *, hidden_size=32):
    """x: (batch, seq, channels) float32 — same convention as the PyTorch module."""
    B, S, C = x.shape
    H = hidden_size
    num_classes = params["fc2_w_t"].shape[1]

    # Time-major, flattened to (S*B, C) so one in-kernel matmul covers every
    # step's layer-0 input projection.
    x2d = jnp.transpose(x, (1, 0, 2)).reshape(S * B, C)

    kernel = functools.partial(_lstmi_kernel, seq_len=S, batch=B, hidden_size=H)
    vmem_spec = pl.BlockSpec(memory_space=pltpu.MemorySpace.VMEM)

    out = pl.pallas_call(
        kernel,
        out_shape=jax.ShapeDtypeStruct((B, num_classes), jnp.float32),
        in_specs=[vmem_spec] * 10,
        out_specs=vmem_spec,
    )(
        x2d,
        params["w_ih0_t"], params["b0"],
        params["w_cat256"],
        params["w_hh1_t"], params["b1"],
        params["fc1_w_t"], params["fc1_b"],
        params["fc2_w_t"], params["fc2_b"],
    )
    return out


# ---------------------------------------------------------------------------
# Deterministic parameter init (same shapes as the PyTorch module's __init__)
# ---------------------------------------------------------------------------
def init_params(key, input_channels, num_classes, hidden_size=32, size_linear_lyr=32):
    H = hidden_size
    k = 1.0 / jnp.sqrt(H)
    keys = jax.random.split(key, 14)

    def u(kk, shape):
        return jax.random.uniform(kk, shape, jnp.float32, -k, k)

    # Layer 0: W_ih (4H, C_in), W_hh (4H, H), b_ih (4H,), b_hh (4H,)
    w_ih0 = u(keys[0], (4 * H, input_channels))
    w_hh0 = u(keys[1], (4 * H, H))
    b_ih0 = u(keys[2], (4 * H,))
    b_hh0 = u(keys[3], (4 * H,))
    # Layer 1: input is hidden of layer 0
    w_ih1 = u(keys[4], (4 * H, H))
    w_hh1 = u(keys[5], (4 * H, H))
    b_ih1 = u(keys[6], (4 * H,))
    b_hh1 = u(keys[7], (4 * H,))
    # fc1: (size_linear_lyr, H), fc2: (num_classes, size_linear_lyr)
    fc1_w = u(keys[8], (size_linear_lyr, H))
    fc1_b = u(keys[9], (size_linear_lyr,))
    fc2_w = u(keys[10], (num_classes, size_linear_lyr))
    fc2_b = u(keys[11], (num_classes,))

    # Pre-transpose weights so the kernel does x @ W^T as plain row-major matmuls,
    # fold the two LSTM bias vectors into one (1, 4H) row, and pre-concatenate
    # [W_ih1^T | W_hh0^T] along the output dim so the kernel uses a single fused
    # (H, 8H) dot per step for both h1(t) consumers.
    w_ih0_t = w_ih0.T
    w_hh0_t = w_hh0.T
    w_ih1_t = w_ih1.T
    w_hh1_t = w_hh1.T
    return {
        "w_ih0_t": w_ih0_t, "w_hh0_t": w_hh0_t, "b0": (b_ih0 + b_hh0)[None, :],
        "w_ih1_t": w_ih1_t, "w_hh1_t": w_hh1_t, "b1": (b_ih1 + b_hh1)[None, :],
        "w_cat256": jnp.concatenate([w_ih1_t, w_hh0_t], axis=1),   # (H, 8H)
        "fc1_w_t": fc1_w.T, "fc1_b": fc1_b[None, :],
        "fc2_w_t": fc2_w.T, "fc2_b": fc2_b[None, :],
    }


# ---------------------------------------------------------------------------
# Pure-JAX reference (mirrors PyTorch nn.LSTM eval-mode semantics) for a check.
# ---------------------------------------------------------------------------
def reference_forward(x, params, hidden_size=32):
    B, S, C = x.shape
    H = hidden_size

    def cell(x_t, h, c, w_ih_t, w_hh_t, b):
        g = x_t @ w_ih_t + h @ w_hh_t + b
        i = jax.nn.sigmoid(g[:, 0:H])
        f = jax.nn.sigmoid(g[:, H:2 * H])
        gg = jnp.tanh(g[:, 2 * H:3 * H])
        o = jax.nn.sigmoid(g[:, 3 * H:4 * H])
        c = f * c + i * gg
        h = o * jnp.tanh(c)
        return h, c

    h1 = jnp.zeros((B, H)); c1 = jnp.zeros((B, H))
    h2 = jnp.zeros((B, H)); c2 = jnp.zeros((B, H))
    for t in range(S):
        h1, c1 = cell(x[:, t, :], h1, c1, params["w_ih0_t"], params["w_hh0_t"], params["b0"])
        h2, c2 = cell(h1, h2, c2, params["w_ih1_t"], params["w_hh1_t"], params["b1"])
    z = jnp.maximum(h2 @ params["fc1_w_t"] + params["fc1_b"], 0.0)
    return z @ params["fc2_w_t"] + params["fc2_b"]


if __name__ == "__main__":
    # Small shapes consistent with the module's forward: (batch, seq, input_channels)
    B, S, C = 8, 8, 4
    H = 32
    NUM_CLASSES = 4

    key = jax.random.PRNGKey(0)
    k_x, k_p = jax.random.split(key)
    x = jax.random.normal(k_x, (B, S, C), jnp.float32)
    params = init_params(k_p, input_channels=C, num_classes=NUM_CLASSES,
                         hidden_size=H, size_linear_lyr=32)

    out = lstmi_forward(x, params, hidden_size=H)
    out = jax.block_until_ready(out)

    ref = reference_forward(x, params, hidden_size=H)
    assert out.shape == (B, NUM_CLASSES)
    assert jnp.allclose(out, ref, atol=2e-4, rtol=1e-4), "Pallas kernel mismatch vs reference"

    print("KERNEL_OK")
</pallas_src>

<mosaic_0001>
module attributes {stable_mosaic.version = 11 : i64} {
  func.func @_lstmi_kernel(%arg0: memref<64x4xf32, #tpu.memory_space<vmem>>, %arg1: memref<4x128xf32, #tpu.memory_space<vmem>>, %arg2: memref<1x128xf32, #tpu.memory_space<vmem>>, %arg3: memref<32x256xf32, #tpu.memory_space<vmem>>, %arg4: memref<32x128xf32, #tpu.memory_space<vmem>>, %arg5: memref<1x128xf32, #tpu.memory_space<vmem>>, %arg6: memref<32x32xf32, #tpu.memory_space<vmem>>, %arg7: memref<1x32xf32, #tpu.memory_space<vmem>>, %arg8: memref<32x4xf32, #tpu.memory_space<vmem>>, %arg9: memref<1x4xf32, #tpu.memory_space<vmem>>, %arg10: memref<8x4xf32, #tpu.memory_space<vmem>>) attributes {dimension_semantics = [], scalar_prefetch = 0 : i64, scratch_operands = 0 : i64, tpu.core_type = #tpu.core_type<tc>} {
    %c0 = arith.constant 0 : index
    %c0_0 = arith.constant 0 : index
    %0 = vector.load %arg0[%c0, %c0_0] : memref<64x4xf32, #tpu.memory_space<vmem>>, vector<64x4xf32>
    %c0_1 = arith.constant 0 : index
    %c0_2 = arith.constant 0 : index
    %1 = vector.load %arg1[%c0_1, %c0_2] : memref<4x128xf32, #tpu.memory_space<vmem>>, vector<4x128xf32>
    %cst = arith.constant dense<0.000000e+00> : vector<64x128xf32>
    %2 = tpu.matmul %0, %1, %cst {dimension_numbers = #tpu.dot_dimension_numbers<[1], [0], [0], [1], [0, 0, 1, 1], [], []>} : vector<64x4xf32>, vector<4x128xf32>, vector<64x128xf32> -> vector<64x128xf32>
    %c0_3 = arith.constant 0 : index
    %c0_4 = arith.constant 0 : index
    %3 = vector.load %arg2[%c0_3, %c0_4] : memref<1x128xf32, #tpu.memory_space<vmem>>, vector<1x128xf32>
    %4 = vector.broadcast %3 : vector<1x128xf32> to vector<64x128xf32>
    %5 = arith.addf %2, %4 : vector<64x128xf32>
    %c0_5 = arith.constant 0 : index
    %c0_6 = arith.constant 0 : index
    %6 = vector.load %arg3[%c0_5, %c0_6] : memref<32x256xf32, #tpu.memory_space<vmem>>, vector<32x256xf32>
    %c0_7 = arith.constant 0 : index
    %c0_8 = arith.constant 0 : index
    %7 = vector.load %arg4[%c0_7, %c0_8] : memref<32x128xf32, #tpu.memory_space<vmem>>, vector<32x128xf32>
    %c0_9 = arith.constant 0 : index
    %c0_10 = arith.constant 0 : index
    %8 = vector.load %arg5[%c0_9, %c0_10] : memref<1x128xf32, #tpu.memory_space<vmem>>, vector<1x128xf32>
    %9 = vector.shape_cast %8 : vector<1x128xf32> to vector<1x128xf32>
    %10 = vector.broadcast %9 : vector<1x128xf32> to vector<8x128xf32>
    %11 = vector.extract_strided_slice %5 {offsets = [0, 0], sizes = [8, 128], strides = [1, 1]} : vector<64x128xf32> to vector<8x128xf32>
    %12 = arith.negf %11 : vector<8x128xf32>
    %13 = math.exp %12 : vector<8x128xf32>
    %cst_11 = arith.constant 1.000000e+00 : f32
    %14 = vector.broadcast %cst_11 : f32 to vector<8x128xf32>
    %15 = arith.addf %14, %13 : vector<8x128xf32>
    %16 = arith.divf %14, %15 : vector<8x128xf32>
    %17 = math.tanh %11 : vector<8x128xf32>
    %18 = vector.extract_strided_slice %16 {offsets = [0, 0], sizes = [8, 32], strides = [1, 1]} : vector<8x128xf32> to vector<8x32xf32>
    %19 = vector.extract_strided_slice %17 {offsets = [0, 64], sizes = [8, 32], strides = [1, 1]} : vector<8x128xf32> to vector<8x32xf32>
    %20 = vector.extract_strided_slice %16 {offsets = [0, 96], sizes = [8, 32], strides = [1, 1]} : vector<8x128xf32> to vector<8x32xf32>
    %21 = arith.mulf %18, %19 : vector<8x32xf32>
    %22 = math.tanh %21 : vector<8x32xf32>
    %23 = arith.mulf %20, %22 : vector<8x32xf32>
    %cst_12 = arith.constant dense<0.000000e+00> : vector<8x256xf32>
    %24 = tpu.matmul %23, %6, %cst_12 {dimension_numbers = #tpu.dot_dimension_numbers<[1], [0], [0], [1], [0, 0, 1, 1], [], []>} : vector<8x32xf32>, vector<32x256xf32>, vector<8x256xf32> -> vector<8x256xf32>
    %25 = vector.extract_strided_slice %24 {offsets = [0, 128], sizes = [8, 128], strides = [1, 1]} : vector<8x256xf32> to vector<8x128xf32>
    %26 = vector.extract_strided_slice %24 {offsets = [0, 0], sizes = [8, 128], strides = [1, 1]} : vector<8x256xf32> to vector<8x128xf32>
    %27 = arith.addf %26, %10 : vector<8x128xf32>
    %28 = arith.negf %27 : vector<8x128xf32>
    %29 = math.exp %28 : vector<8x128xf32>
    %cst_13 = arith.constant 1.000000e+00 : f32
    %30 = vector.broadcast %cst_13 : f32 to vector<8x128xf32>
    %31 = arith.addf %30, %29 : vector<8x128xf32>
    %32 = arith.divf %30, %31 : vector<8x128xf32>
    %33 = math.tanh %27 : vector<8x128xf32>
    %34 = vector.extract_strided_slice %32 {offsets = [0, 0], sizes = [8, 32], strides = [1, 1]} : vector<8x128xf32> to vector<8x32xf32>
    %35 = vector.extract_strided_slice %33 {offsets = [0, 64], sizes = [8, 32], strides = [1, 1]} : vector<8x128xf32> to vector<8x32xf32>
    %36 = vector.extract_strided_slice %32 {offsets = [0, 96], sizes = [8, 32], strides = [1, 1]} : vector<8x128xf32> to vector<8x32xf32>
    %37 = arith.mulf %34, %35 : vector<8x32xf32>
    %38 = math.tanh %37 : vector<8x32xf32>
    %39 = arith.mulf %36, %38 : vector<8x32xf32>
    %cst_14 = arith.constant dense<0.000000e+00> : vector<8x128xf32>
    %40 = tpu.matmul %39, %7, %cst_14 {dimension_numbers = #tpu.dot_dimension_numbers<[1], [0], [0], [1], [0, 0, 1, 1], [], []>} : vector<8x32xf32>, vector<32x128xf32>, vector<8x128xf32> -> vector<8x128xf32>
    %41 = arith.addf %40, %10 : vector<8x128xf32>
    %42 = vector.extract_strided_slice %5 {offsets = [8, 0], sizes = [8, 128], strides = [1, 1]} : vector<64x128xf32> to vector<8x128xf32>
    %43 = arith.addf %42, %25 : vector<8x128xf32>
    %44 = arith.negf %43 : vector<8x128xf32>
    %45 = math.exp %44 : vector<8x128xf32>
    %cst_15 = arith.constant 1.000000e+00 : f32
    %46 = vector.broadcast %cst_15 : f32 to vector<8x128xf32>
    %47 = arith.addf %46, %45 : vector<8x128xf32>
    %48 = arith.divf %46, %47 : vector<8x128xf32>
    %49 = math.tanh %43 : vector<8x128xf32>
    %50 = vector.extract_strided_slice %48 {offsets = [0, 0], sizes = [8, 32], strides = [1, 1]} : vector<8x128xf32> to vector<8x32xf32>
    %51 = vector.extract_strided_slice %48 {offsets = [0, 32], sizes = [8, 32], strides = [1, 1]} : vector<8x128xf32> to vector<8x32xf32>
    %52 = vector.extract_strided_slice %49 {offsets = [0, 64], sizes = [8, 32], strides = [1, 1]} : vector<8x128xf32> to vector<8x32xf32>
    %53 = vector.extract_strided_slice %48 {offsets = [0, 96], sizes = [8, 32], strides = [1, 1]} : vector<8x128xf32> to vector<8x32xf32>
    %54 = arith.mulf %51, %21 : vector<8x32xf32>
    %55 = arith.mulf %50, %52 : vector<8x32xf32>
    %56 = arith.addf %54, %55 : vector<8x32xf32>
    %57 = math.tanh %56 : vector<8x32xf32>
    %58 = arith.mulf %53, %57 : vector<8x32xf32>
    %cst_16 = arith.constant dense<0.000000e+00> : vector<8x256xf32>
    %59 = tpu.matmul %58, %6, %cst_16 {dimension_numbers = #tpu.dot_dimension_numbers<[1], [0], [0], [1], [0, 0, 1, 1], [], []>} : vector<8x32xf32>, vector<32x256xf32>, vector<8x256xf32> -> vector<8x256xf32>
    %60 = vector.extract_strided_slice %59 {offsets = [0, 128], sizes = [8, 128], strides = [1, 1]} : vector<8x256xf32> to vector<8x128xf32>
    %61 = vector.extract_strided_slice %59 {offsets = [0, 0], sizes = [8, 128], strides = [1, 1]} : vector<8x256xf32> to vector<8x128xf32>
    %62 = arith.addf %61, %41 : vector<8x128xf32>
    %63 = arith.negf %62 : vector<8x128xf32>
    %64 = math.exp %63 : vector<8x128xf32>
    %cst_17 = arith.constant 1.000000e+00 : f32
    %65 = vector.broadcast %cst_17 : f32 to vector<8x128xf32>
    %66 = arith.addf %65, %64 : vector<8x128xf32>
    %67 = arith.divf %65, %66 : vector<8x128xf32>
    %68 = math.tanh %62 : vector<8x128xf32>
    %69 = vector.extract_strided_slice %67 {offsets = [0, 0], sizes = [8, 32], strides = [1, 1]} : vector<8x128xf32> to vector<8x32xf32>
    %70 = vector.extract_strided_slice %67 {offsets = [0, 32], sizes = [8, 32], strides = [1, 1]} : vector<8x128xf32> to vector<8x32xf32>
    %71 = vector.extract_strided_slice %68 {offsets = [0, 64], sizes = [8, 32], strides = [1, 1]} : vector<8x128xf32> to vector<8x32xf32>
    %72 = vector.extract_strided_slice %67 {offsets = [0, 96], sizes = [8, 32], strides = [1, 1]} : vector<8x128xf32> to vector<8x32xf32>
    %73 = arith.mulf %70, %37 : vector<8x32xf32>
    %74 = arith.mulf %69, %71 : vector<8x32xf32>
    %75 = arith.addf %73, %74 : vector<8x32xf32>
    %76 = math.tanh %75 : vector<8x32xf32>
    %77 = arith.mulf %72, %76 : vector<8x32xf32>
    %cst_18 = arith.constant dense<0.000000e+00> : vector<8x128xf32>
    %78 = tpu.matmul %77, %7, %cst_18 {dimension_numbers = #tpu.dot_dimension_numbers<[1], [0], [0], [1], [0, 0, 1, 1], [], []>} : vector<8x32xf32>, vector<32x128xf32>, vector<8x128xf32> -> vector<8x128xf32>
    %79 = arith.addf %78, %10 : vector<8x128xf32>
    %80 = vector.extract_strided_slice %5 {offsets = [16, 0], sizes = [8, 128], strides = [1, 1]} : vector<64x128xf32> to vector<8x128xf32>
    %81 = arith.addf %80, %60 : vector<8x128xf32>
    %82 = arith.negf %81 : vector<8x128xf32>
    %83 = math.exp %82 : vector<8x128xf32>
    %cst_19 = arith.constant 1.000000e+00 : f32
    %84 = vector.broadcast %cst_19 : f32 to vector<8x128xf32>
    %85 = arith.addf %84, %83 : vector<8x128xf32>
    %86 = arith.divf %84, %85 : vector<8x128xf32>
    %87 = math.tanh %81 : vector<8x128xf32>
    %88 = vector.extract_strided_slice %86 {offsets = [0, 0], sizes = [8, 32], strides = [1, 1]} : vector<8x128xf32> to vector<8x32xf32>
    %89 = vector.extract_strided_slice %86 {offsets = [0, 32], sizes = [8, 32], strides = [1, 1]} : vector<8x128xf32> to vector<8x32xf32>
    %90 = vector.extract_strided_slice %87 {offsets = [0, 64], sizes = [8, 32], strides = [1, 1]} : vector<8x128xf32> to vector<8x32xf32>
    %91 = vector.extract_strided_slice %86 {offsets = [0, 96], sizes = [8, 32], strides = [1, 1]} : vector<8x128xf32> to vector<8x32xf32>
    %92 = arith.mulf %89, %56 : vector<8x32xf32>
    %93 = arith.mulf %88, %90 : vector<8x32xf32>
    %94 = arith.addf %92, %93 : vector<8x32xf32>
    %95 = math.tanh %94 : vector<8x32xf32>
    %96 = arith.mulf %91, %95 : vector<8x32xf32>
    %cst_20 = arith.constant dense<0.000000e+00> : vector<8x256xf32>
    %97 = tpu.matmul %96, %6, %cst_20 {dimension_numbers = #tpu.dot_dimension_numbers<[1], [0], [0], [1], [0, 0, 1, 1], [], []>} : vector<8x32xf32>, vector<32x256xf32>, vector<8x256xf32> -> vector<8x256xf32>
    %98 = vector.extract_strided_slice %97 {offsets = [0, 128], sizes = [8, 128], strides = [1, 1]} : vector<8x256xf32> to vector<8x128xf32>
    %99 = vector.extract_strided_slice %97 {offsets = [0, 0], sizes = [8, 128], strides = [1, 1]} : vector<8x256xf32> to vector<8x128xf32>
    %100 = arith.addf %99, %79 : vector<8x128xf32>
    %101 = arith.negf %100 : vector<8x128xf32>
    %102 = math.exp %101 : vector<8x128xf32>
    %cst_21 = arith.constant 1.000000e+00 : f32
    %103 = vector.broadcast %cst_21 : f32 to vector<8x128xf32>
    %104 = arith.addf %103, %102 : vector<8x128xf32>
    %105 = arith.divf %103, %104 : vector<8x128xf32>
    %106 = math.tanh %100 : vector<8x128xf32>
    %107 = vector.extract_strided_slice %105 {offsets = [0, 0], sizes = [8, 32], strides = [1, 1]} : vector<8x128xf32> to vector<8x32xf32>
    %108 = vector.extract_strided_slice %105 {offsets = [0, 32], sizes = [8, 32], strides = [1, 1]} : vector<8x128xf32> to vector<8x32xf32>
    %109 = vector.extract_strided_slice %106 {offsets = [0, 64], sizes = [8, 32], strides = [1, 1]} : vector<8x128xf32> to vector<8x32xf32>
    %110 = vector.extract_strided_slice %105 {offsets = [0, 96], sizes = [8, 32], strides = [1, 1]} : vector<8x128xf32> to vector<8x32xf32>
    %111 = arith.mulf %108, %75 : vector<8x32xf32>
    %112 = arith.mulf %107, %109 : vector<8x32xf32>
    %113 = arith.addf %111, %112 : vector<8x32xf32>
    %114 = math.tanh %113 : vector<8x32xf32>
    %115 = arith.mulf %110, %114 : vector<8x32xf32>
    %cst_22 = arith.constant dense<0.000000e+00> : vector<8x128xf32>
    %116 = tpu.matmul %115, %7, %cst_22 {dimension_numbers = #tpu.dot_dimension_numbers<[1], [0], [0], [1], [0, 0, 1, 1], [], []>} : vector<8x32xf32>, vector<32x128xf32>, vector<8x128xf32> -> vector<8x128xf32>
    %117 = arith.addf %116, %10 : vector<8x128xf32>
    %118 = vector.extract_strided_slice %5 {offsets = [24, 0], sizes = [8, 128], strides = [1, 1]} : vector<64x128xf32> to vector<8x128xf32>
    %119 = arith.addf %118, %98 : vector<8x128xf32>
    %120 = arith.negf %119 : vector<8x128xf32>
    %121 = math.exp %120 : vector<8x128xf32>
    %cst_23 = arith.constant 1.000000e+00 : f32
    %122 = vector.broadcast %cst_23 : f32 to vector<8x128xf32>
    %123 = arith.addf %122, %121 : vector<8x128xf32>
    %124 = arith.divf %122, %123 : vector<8x128xf32>
    %125 = math.tanh %119 : vector<8x128xf32>
    %126 = vector.extract_strided_slice %124 {offsets = [0, 0], sizes = [8, 32], strides = [1, 1]} : vector<8x128xf32> to vector<8x32xf32>
    %127 = vector.extract_strided_slice %124 {offsets = [0, 32], sizes = [8, 32], strides = [1, 1]} : vector<8x128xf32> to vector<8x32xf32>
    %128 = vector.extract_strided_slice %125 {offsets = [0, 64], sizes = [8, 32], strides = [1, 1]} : vector<8x128xf32> to vector<8x32xf32>
    %129 = vector.extract_strided_slice %124 {offsets = [0, 96], sizes = [8, 32], strides = [1, 1]} : vector<8x128xf32> to vector<8x32xf32>
    %130 = arith.mulf %127, %94 : vector<8x32xf32>
    %131 = arith.mulf %126, %128 : vector<8x32xf32>
    %132 = arith.addf %130, %131 : vector<8x32xf32>
    %133 = math.tanh %132 : vector<8x32xf32>
    %134 = arith.mulf %129, %133 : vector<8x32xf32>
    %cst_24 = arith.constant dense<0.000000e+00> : vector<8x256xf32>
    %135 = tpu.matmul %134, %6, %cst_24 {dimension_numbers = #tpu.dot_dimension_numbers<[1], [0], [0], [1], [0, 0, 1, 1], [], []>} : vector<8x32xf32>, vector<32x256xf32>, vector<8x256xf32> -> vector<8x256xf32>
    %136 = vector.extract_strided_slice %135 {offsets = [0, 128], sizes = [8, 128], strides = [1, 1]} : vector<8x256xf32> to vector<8x128xf32>
    %137 = vector.extract_strided_slice %135 {offsets = [0, 0], sizes = [8, 128], strides = [1, 1]} : vector<8x256xf32> to vector<8x128xf32>
    %138 = arith.addf %137, %117 : vector<8x128xf32>
    %139 = arith.negf %138 : vector<8x128xf32>
    %140 = math.exp %139 : vector<8x128xf32>
    %cst_25 = arith.constant 1.000000e+00 : f32
    %141 = vector.broadcast %cst_25 : f32 to vector<8x128xf32>
    %142 = arith.addf %141, %140 : vector<8x128xf32>
    %143 = arith.divf %141, %142 : vector<8x128xf32>
    %144 = math.tanh %138 : vector<8x128xf32>
    %145 = vector.extract_strided_slice %143 {offsets = [0, 0], sizes = [8, 32], strides = [1, 1]} : vector<8x128xf32> to vector<8x32xf32>
    %146 = vector.extract_strided_slice %143 {offsets = [0, 32], sizes = [8, 32], strides = [1, 1]} : vector<8x128xf32> to vector<8x32xf32>
    %147 = vector.extract_strided_slice %144 {offsets = [0, 64], sizes = [8, 32], strides = [1, 1]} : vector<8x128xf32> to vector<8x32xf32>
    %148 = vector.extract_strided_slice %143 {offsets = [0, 96], sizes = [8, 32], strides = [1, 1]} : vector<8x128xf32> to vector<8x32xf32>
    %149 = arith.mulf %146, %113 : vector<8x32xf32>
    %150 = arith.mulf %145, %147 : vector<8x32xf32>
    %151 = arith.addf %149, %150 : vector<8x32xf32>
    %152 = math.tanh %151 : vector<8x32xf32>
    %153 = arith.mulf %148, %152 : vector<8x32xf32>
    %cst_26 = arith.constant dense<0.000000e+00> : vector<8x128xf32>
    %154 = tpu.matmul %153, %7, %cst_26 {dimension_numbers = #tpu.dot_dimension_numbers<[1], [0], [0], [1], [0, 0, 1, 1], [], []>} : vector<8x32xf32>, vector<32x128xf32>, vector<8x128xf32> -> vector<8x128xf32>
    %155 = arith.addf %154, %10 : vector<8x128xf32>
    %156 = vector.extract_strided_slice %5 {offsets = [32, 0], sizes = [8, 128], strides = [1, 1]} : vector<64x128xf32> to vector<8x128xf32>
    %157 = arith.addf %156, %136 : vector<8x128xf32>
    %158 = arith.negf %157 : vector<8x128xf32>
    %159 = math.exp %158 : vector<8x128xf32>
    %cst_27 = arith.constant 1.000000e+00 : f32
    %160 = vector.broadcast %cst_27 : f32 to vector<8x128xf32>
    %161 = arith.addf %160, %159 : vector<8x128xf32>
    %162 = arith.divf %160, %161 : vector<8x128xf32>
    %163 = math.tanh %157 : vector<8x128xf32>
    %164 = vector.extract_strided_slice %162 {offsets = [0, 0], sizes = [8, 32], strides = [1, 1]} : vector<8x128xf32> to vector<8x32xf32>
    %165 = vector.extract_strided_slice %162 {offsets = [0, 32], sizes = [8, 32], strides = [1, 1]} : vector<8x128xf32> to vector<8x32xf32>
    %166 = vector.extract_strided_slice %163 {offsets = [0, 64], sizes = [8, 32], strides = [1, 1]} : vector<8x128xf32> to vector<8x32xf32>
    %167 = vector.extract_strided_slice %162 {offsets = [0, 96], sizes = [8, 32], strides = [1, 1]} : vector<8x128xf32> to vector<8x32xf32>
    %168 = arith.mulf %165, %132 : vector<8x32xf32>
    %169 = arith.mulf %164, %166 : vector<8x32xf32>
    %170 = arith.addf %168, %169 : vector<8x32xf32>
    %171 = math.tanh %170 : vector<8x32xf32>
    %172 = arith.mulf %167, %171 : vector<8x32xf32>
    %cst_28 = arith.constant dense<0.000000e+00> : vector<8x256xf32>
    %173 = tpu.matmul %172, %6, %cst_28 {dimension_numbers = #tpu.dot_dimension_numbers<[1], [0], [0], [1], [0, 0, 1, 1], [], []>} : vector<8x32xf32>, vector<32x256xf32>, vector<8x256xf32> -> vector<8x256xf32>
    %174 = vector.extract_strided_slice %173 {offsets = [0, 128], sizes = [8, 128], strides = [1, 1]} : vector<8x256xf32> to vector<8x128xf32>
    %175 = vector.extract_strided_slice %173 {offsets = [0, 0], sizes = [8, 128], strides = [1, 1]} : vector<8x256xf32> to vector<8x128xf32>
    %176 = arith.addf %175, %155 : vector<8x128xf32>
    %177 = arith.negf %176 : vector<8x128xf32>
    %178 = math.exp %177 : vector<8x128xf32>
    %cst_29 = arith.constant 1.000000e+00 : f32
    %179 = vector.broadcast %cst_29 : f32 to vector<8x128xf32>
    %180 = arith.addf %179, %178 : vector<8x128xf32>
    %181 = arith.divf %179, %180 : vector<8x128xf32>
    %182 = math.tanh %176 : vector<8x128xf32>
    %183 = vector.extract_strided_slice %181 {offsets = [0, 0], sizes = [8, 32], strides = [1, 1]} : vector<8x128xf32> to vector<8x32xf32>
    %184 = vector.extract_strided_slice %181 {offsets = [0, 32], sizes = [8, 32], strides = [1, 1]} : vector<8x128xf32> to vector<8x32xf32>
    %185 = vector.extract_strided_slice %182 {offsets = [0, 64], sizes = [8, 32], strides = [1, 1]} : vector<8x128xf32> to vector<8x32xf32>
    %186 = vector.extract_strided_slice %181 {offsets = [0, 96], sizes = [8, 32], strides = [1, 1]} : vector<8x128xf32> to vector<8x32xf32>
    %187 = arith.mulf %184, %151 : vector<8x32xf32>
    %188 = arith.mulf %183, %185 : vector<8x32xf32>
    %189 = arith.addf %187, %188 : vector<8x32xf32>
    %190 = math.tanh %189 : vector<8x32xf32>
    %191 = arith.mulf %186, %190 : vector<8x32xf32>
    %cst_30 = arith.constant dense<0.000000e+00> : vector<8x128xf32>
    %192 = tpu.matmul %191, %7, %cst_30 {dimension_numbers = #tpu.dot_dimension_numbers<[1], [0], [0], [1], [0, 0, 1, 1], [], []>} : vector<8x32xf32>, vector<32x128xf32>, vector<8x128xf32> -> vector<8x128xf32>
    %193 = arith.addf %192, %10 : vector<8x128xf32>
    %194 = vector.extract_strided_slice %5 {offsets = [40, 0], sizes = [8, 128], strides = [1, 1]} : vector<64x128xf32> to vector<8x128xf32>
    %195 = arith.addf %194, %174 : vector<8x128xf32>
    %196 = arith.negf %195 : vector<8x128xf32>
    %197 = math.exp %196 : vector<8x128xf32>
    %cst_31 = arith.constant 1.000000e+00 : f32
    %198 = vector.broadcast %cst_31 : f32 to vector<8x128xf32>
    %199 = arith.addf %198, %197 : vector<8x128xf32>
    %200 = arith.divf %198, %199 : vector<8x128xf32>
    %201 = math.tanh %195 : vector<8x128xf32>
    %202 = vector.extract_strided_slice %200 {offsets = [0, 0], sizes = [8, 32], strides = [1, 1]} : vector<8x128xf32> to vector<8x32xf32>
    %203 = vector.extract_strided_slice %200 {offsets = [0, 32], sizes = [8, 32], strides = [1, 1]} : vector<8x128xf32> to vector<8x32xf32>
    %204 = vector.extract_strided_slice %201 {offsets = [0, 64], sizes = [8, 32], strides = [1, 1]} : vector<8x128xf32> to vector<8x32xf32>
    %205 = vector.extract_strided_slice %200 {offsets = [0, 96], sizes = [8, 32], strides = [1, 1]} : vector<8x128xf32> to vector<8x32xf32>
    %206 = arith.mulf %203, %170 : vector<8x32xf32>
    %207 = arith.mulf %202, %204 : vector<8x32xf32>
    %208 = arith.addf %206, %207 : vector<8x32xf32>
    %209 = math.tanh %208 : vector<8x32xf32>
    %210 = arith.mulf %205, %209 : vector<8x32xf32>
    %cst_32 = arith.constant dense<0.000000e+00> : vector<8x256xf32>
    %211 = tpu.matmul %210, %6, %cst_32 {dimension_numbers = #tpu.dot_dimension_numbers<[1], [0], [0], [1], [0, 0, 1, 1], [], []>} : vector<8x32xf32>, vector<32x256xf32>, vector<8x256xf32> -> vector<8x256xf32>
    %212 = vector.extract_strided_slice %211 {offsets = [0, 128], sizes = [8, 128], strides = [1, 1]} : vector<8x256xf32> to vector<8x128xf32>
    %213 = vector.extract_strided_slice %211 {offsets = [0, 0], sizes = [8, 128], strides = [1, 1]} : vector<8x256xf32> to vector<8x128xf32>
    %214 = arith.addf %213, %193 : vector<8x128xf32>
    %215 = arith.negf %214 : vector<8x128xf32>
    %216 = math.exp %215 : vector<8x128xf32>
    %cst_33 = arith.constant 1.000000e+00 : f32
    %217 = vector.broadcast %cst_33 : f32 to vector<8x128xf32>
    %218 = arith.addf %217, %216 : vector<8x128xf32>
    %219 = arith.divf %217, %218 : vector<8x128xf32>
    %220 = math.tanh %214 : vector<8x128xf32>
    %221 = vector.extract_strided_slice %219 {offsets = [0, 0], sizes = [8, 32], strides = [1, 1]} : vector<8x128xf32> to vector<8x32xf32>
    %222 = vector.extract_strided_slice %219 {offsets = [0, 32], sizes = [8, 32], strides = [1, 1]} : vector<8x128xf32> to vector<8x32xf32>
    %223 = vector.extract_strided_slice %220 {offsets = [0, 64], sizes = [8, 32], strides = [1, 1]} : vector<8x128xf32> to vector<8x32xf32>
    %224 = vector.extract_strided_slice %219 {offsets = [0, 96], sizes = [8, 32], strides = [1, 1]} : vector<8x128xf32> to vector<8x32xf32>
    %225 = arith.mulf %222, %189 : vector<8x32xf32>
    %226 = arith.mulf %221, %223 : vector<8x32xf32>
    %227 = arith.addf %225, %226 : vector<8x32xf32>
    %228 = math.tanh %227 : vector<8x32xf32>
    %229 = arith.mulf %224, %228 : vector<8x32xf32>
    %cst_34 = arith.constant dense<0.000000e+00> : vector<8x128xf32>
    %230 = tpu.matmul %229, %7, %cst_34 {dimension_numbers = #tpu.dot_dimension_numbers<[1], [0], [0], [1], [0, 0, 1, 1], [], []>} : vector<8x32xf32>, vector<32x128xf32>, vector<8x128xf32> -> vector<8x128xf32>
    %231 = arith.addf %230, %10 : vector<8x128xf32>
    %232 = vector.extract_strided_slice %5 {offsets = [48, 0], sizes = [8, 128], strides = [1, 1]} : vector<64x128xf32> to vector<8x128xf32>
    %233 = arith.addf %232, %212 : vector<8x128xf32>
    %234 = arith.negf %233 : vector<8x128xf32>
    %235 = math.exp %234 : vector<8x128xf32>
    %cst_35 = arith.constant 1.000000e+00 : f32
    %236 = vector.broadcast %cst_35 : f32 to vector<8x128xf32>
    %237 = arith.addf %236, %235 : vector<8x128xf32>
    %238 = arith.divf %236, %237 : vector<8x128xf32>
    %239 = math.tanh %233 : vector<8x128xf32>
    %240 = vector.extract_strided_slice %238 {offsets = [0, 0], sizes = [8, 32], strides = [1, 1]} : vector<8x128xf32> to vector<8x32xf32>
    %241 = vector.extract_strided_slice %238 {offsets = [0, 32], sizes = [8, 32], strides = [1, 1]} : vector<8x128xf32> to vector<8x32xf32>
    %242 = vector.extract_strided_slice %239 {offsets = [0, 64], sizes = [8, 32], strides = [1, 1]} : vector<8x128xf32> to vector<8x32xf32>
    %243 = vector.extract_strided_slice %238 {offsets = [0, 96], sizes = [8, 32], strides = [1, 1]} : vector<8x128xf32> to vector<8x32xf32>
    %244 = arith.mulf %241, %208 : vector<8x32xf32>
    %245 = arith.mulf %240, %242 : vector<8x32xf32>
    %246 = arith.addf %244, %245 : vector<8x32xf32>
    %247 = math.tanh %246 : vector<8x32xf32>
    %248 = arith.mulf %243, %247 : vector<8x32xf32>
    %cst_36 = arith.constant dense<0.000000e+00> : vector<8x256xf32>
    %249 = tpu.matmul %248, %6, %cst_36 {dimension_numbers = #tpu.dot_dimension_numbers<[1], [0], [0], [1], [0, 0, 1, 1], [], []>} : vector<8x32xf32>, vector<32x256xf32>, vector<8x256xf32> -> vector<8x256xf32>
    %250 = vector.extract_strided_slice %249 {offsets = [0, 128], sizes = [8, 128], strides = [1, 1]} : vector<8x256xf32> to vector<8x128xf32>
    %251 = vector.extract_strided_slice %249 {offsets = [0, 0], sizes = [8, 128], strides = [1, 1]} : vector<8x256xf32> to vector<8x128xf32>
    %252 = arith.addf %251, %231 : vector<8x128xf32>
    %253 = arith.negf %252 : vector<8x128xf32>
    %254 = math.exp %253 : vector<8x128xf32>
    %cst_37 = arith.constant 1.000000e+00 : f32
    %255 = vector.broadcast %cst_37 : f32 to vector<8x128xf32>
    %256 = arith.addf %255, %254 : vector<8x128xf32>
    %257 = arith.divf %255, %256 : vector<8x128xf32>
    %258 = math.tanh %252 : vector<8x128xf32>
    %259 = vector.extract_strided_slice %257 {offsets = [0, 0], sizes = [8, 32], strides = [1, 1]} : vector<8x128xf32> to vector<8x32xf32>
    %260 = vector.extract_strided_slice %257 {offsets = [0, 32], sizes = [8, 32], strides = [1, 1]} : vector<8x128xf32> to vector<8x32xf32>
    %261 = vector.extract_strided_slice %258 {offsets = [0, 64], sizes = [8, 32], strides = [1, 1]} : vector<8x128xf32> to vector<8x32xf32>
    %262 = vector.extract_strided_slice %257 {offsets = [0, 96], sizes = [8, 32], strides = [1, 1]} : vector<8x128xf32> to vector<8x32xf32>
    %263 = arith.mulf %260, %227 : vector<8x32xf32>
    %264 = arith.mulf %259, %261 : vector<8x32xf32>
    %265 = arith.addf %263, %264 : vector<8x32xf32>
    %266 = math.tanh %265 : vector<8x32xf32>
    %267 = arith.mulf %262, %266 : vector<8x32xf32>
    %cst_38 = arith.constant dense<0.000000e+00> : vector<8x128xf32>
    %268 = tpu.matmul %267, %7, %cst_38 {dimension_numbers = #tpu.dot_dimension_numbers<[1], [0], [0], [1], [0, 0, 1, 1], [], []>} : vector<8x32xf32>, vector<32x128xf32>, vector<8x128xf32> -> vector<8x128xf32>
    %269 = arith.addf %268, %10 : vector<8x128xf32>
    %270 = vector.extract_strided_slice %5 {offsets = [56, 0], sizes = [8, 128], strides = [1, 1]} : vector<64x128xf32> to vector<8x128xf32>
    %271 = arith.addf %270, %250 : vector<8x128xf32>
    %272 = arith.negf %271 : vector<8x128xf32>
    %273 = math.exp %272 : vector<8x128xf32>
    %cst_39 = arith.constant 1.000000e+00 : f32
    %274 = vector.broadcast %cst_39 : f32 to vector<8x128xf32>
    %275 = arith.addf %274, %273 : vector<8x128xf32>
    %276 = arith.divf %274, %275 : vector<8x128xf32>
    %277 = math.tanh %271 : vector<8x128xf32>
    %278 = vector.extract_strided_slice %276 {offsets = [0, 0], sizes = [8, 32], strides = [1, 1]} : vector<8x128xf32> to vector<8x32xf32>
    %279 = vector.extract_strided_slice %276 {offsets = [0, 32], sizes = [8, 32], strides = [1, 1]} : vector<8x128xf32> to vector<8x32xf32>
    %280 = vector.extract_strided_slice %277 {offsets = [0, 64], sizes = [8, 32], strides = [1, 1]} : vector<8x128xf32> to vector<8x32xf32>
    %281 = vector.extract_strided_slice %276 {offsets = [0, 96], sizes = [8, 32], strides = [1, 1]} : vector<8x128xf32> to vector<8x32xf32>
    %282 = arith.mulf %279, %246 : vector<8x32xf32>
    %283 = arith.mulf %278, %280 : vector<8x32xf32>
    %284 = arith.addf %282, %283 : vector<8x32xf32>
    %285 = math.tanh %284 : vector<8x32xf32>
    %286 = arith.mulf %281, %285 : vector<8x32xf32>
    %cst_40 = arith.constant dense<0.000000e+00> : vector<8x256xf32>
    %287 = tpu.matmul %286, %6, %cst_40 {dimension_numbers = #tpu.dot_dimension_numbers<[1], [0], [0], [1], [0, 0, 1, 1], [], []>} : vector<8x32xf32>, vector<32x256xf32>, vector<8x256xf32> -> vector<8x256xf32>
    %288 = vector.extract_strided_slice %287 {offsets = [0, 0], sizes = [8, 128], strides = [1, 1]} : vector<8x256xf32> to vector<8x128xf32>
    %289 = arith.addf %288, %269 : vector<8x128xf32>
    %290 = arith.negf %289 : vector<8x128xf32>
    %291 = math.exp %290 : vector<8x128xf32>
    %cst_41 = arith.constant 1.000000e+00 : f32
    %292 = vector.broadcast %cst_41 : f32 to vector<8x128xf32>
    %293 = arith.addf %292, %291 : vector<8x128xf32>
    %294 = arith.divf %292, %293 : vector<8x128xf32>
    %295 = math.tanh %289 : vector<8x128xf32>
    %296 = vector.extract_strided_slice %294 {offsets = [0, 0], sizes = [8, 32], strides = [1, 1]} : vector<8x128xf32> to vector<8x32xf32>
    %297 = vector.extract_strided_slice %294 {offsets = [0, 32], sizes = [8, 32], strides = [1, 1]} : vector<8x128xf32> to vector<8x32xf32>
    %298 = vector.extract_strided_slice %295 {offsets = [0, 64], sizes = [8, 32], strides = [1, 1]} : vector<8x128xf32> to vector<8x32xf32>
    %299 = vector.extract_strided_slice %294 {offsets = [0, 96], sizes = [8, 32], strides = [1, 1]} : vector<8x128xf32> to vector<8x32xf32>
    %300 = arith.mulf %297, %265 : vector<8x32xf32>
    %301 = arith.mulf %296, %298 : vector<8x32xf32>
    %302 = arith.addf %300, %301 : vector<8x32xf32>
    %303 = math.tanh %302 : vector<8x32xf32>
    %304 = arith.mulf %299, %303 : vector<8x32xf32>
    %c0_42 = arith.constant 0 : index
    %c0_43 = arith.constant 0 : index
    %305 = vector.load %arg6[%c0_42, %c0_43] : memref<32x32xf32, #tpu.memory_space<vmem>>, vector<32x32xf32>
    %cst_44 = arith.constant dense<0.000000e+00> : vector<8x32xf32>
    %306 = tpu.matmul %304, %305, %cst_44 {dimension_numbers = #tpu.dot_dimension_numbers<[1], [0], [0], [1], [0, 0, 1, 1], [], []>} : vector<8x32xf32>, vector<32x32xf32>, vector<8x32xf32> -> vector<8x32xf32>
    %c0_45 = arith.constant 0 : index
    %c0_46 = arith.constant 0 : index
    %307 = vector.load %arg7[%c0_45, %c0_46] : memref<1x32xf32, #tpu.memory_space<vmem>>, vector<1x32xf32>
    %308 = vector.broadcast %307 : vector<1x32xf32> to vector<8x32xf32>
    %309 = arith.addf %306, %308 : vector<8x32xf32>
    %cst_47 = arith.constant 0.000000e+00 : f32
    %310 = vector.broadcast %cst_47 : f32 to vector<8x32xf32>
    %311 = arith.maximumf %309, %310 : vector<8x32xf32>
    %c0_48 = arith.constant 0 : index
    %c0_49 = arith.constant 0 : index
    %312 = vector.load %arg8[%c0_48, %c0_49] : memref<32x4xf32, #tpu.memory_space<vmem>>, vector<32x4xf32>
    %cst_50 = arith.constant dense<0.000000e+00> : vector<8x4xf32>
    %313 = tpu.matmul %311, %312, %cst_50 {dimension_numbers = #tpu.dot_dimension_numbers<[1], [0], [0], [1], [0, 0, 1, 1], [], []>} : vector<8x32xf32>, vector<32x4xf32>, vector<8x4xf32> -> vector<8x4xf32>
    %c0_51 = arith.constant 0 : index
    %c0_52 = arith.constant 0 : index
    %314 = vector.load %arg9[%c0_51, %c0_52] : memref<1x4xf32, #tpu.memory_space<vmem>>, vector<1x4xf32>
    %315 = vector.broadcast %314 : vector<1x4xf32> to vector<8x4xf32>
    %316 = arith.addf %313, %315 : vector<8x4xf32>
    %c0_53 = arith.constant 0 : index
    %c0_54 = arith.constant 0 : index
    %317 = vector.load %arg10[%c0_53, %c0_54] : memref<8x4xf32, #tpu.memory_space<vmem>>, vector<8x4xf32>
    tpu.vector_store %arg10[%c0_53, %c0_54], %316 {strides = array<i32>} : memref<8x4xf32, #tpu.memory_space<vmem>>, vector<8x4xf32>,
    return
  }
}

</mosaic_0001>

<bundles_post_ra>
// kernel: tpu_custom_call.1
= control target key start
LH: loop header
LB: loop body
LE: loop exit
PB: predicated region body
PF: predicated region fallthrough
CT: control target
= control target key end

     0   :  { %15 = vsyncpa [#allocation3], 0  ;;  %s2041_s0 = inlined_call_operand.vmem [shape: f32[64,4], index: 0, kind: input, shape index: {}]   ;;  %s2042_s1 = inlined_call_operand.vmem [shape: f32[4,128], index: 1, kind: input, shape index: {}]   ;;  %s2043_s2 = inlined_call_operand.vmem [shape: f32[1,128], index: 2, kind: input, shape index: {}]   ;;  %s2044_s3 = inlined_call_operand.vmem [shape: f32[32,256], index: 3, kind: input, shape index: {}]   ;;  %s2045_s4 = inlined_call_operand.vmem [shape: f32[32,128], index: 4, kind: input, shape index: {}]   ;;  %s2046_s5 = inlined_call_operand.vmem [shape: f32[1,128], index: 5, kind: input, shape index: {}]   ;;  %s2047_s6 = inlined_call_operand.hbm [shape: f32[32,32], index: 6, kind: input, shape index: {}]   ;;  %s2048_s7 = inlined_call_operand.vmem [shape: f32[1,32], index: 7, kind: input, shape index: {}]   ;;  %s2049_s8 = inlined_call_operand.vmem [shape: f32[32,4], index: 8, kind: input, shape index: {}]   ;;  %s2050_s9 = inlined_call_operand.hbm [shape: f32[1,4], index: 9, kind: input, shape index: {}]   ;;  %s2051_s10 = inlined_call_operand.vmem [shape: f32[8,4], index: 10, kind: output, shape index: {}]  }
   0x1   :  { %s33_s15 = sshll.u32 %s2047_s6, 4  ;;  %s34_s15 = int_to_ptr.hbm [resolvable:$true] %s33_s15 }
   0x2   :  { %16 = vsyncpa [#allocation5], 0  ;;  %s1599_s16 = smov [#allocation2]   ;;  %s51_s20 = sshll.u32 %s2050_s9, 4  ;;  %s52_s20 = int_to_ptr.hbm [resolvable:$true] %s51_s20 }
   0x3   :  { %s35_s17 = sshll.u32 %s1599_s16, 4  ;;  %s1600_s21 = smov 128   ;;  %s36_s17 = int_to_ptr.vmem [resolvable:$true] %s35_s17 }
   0x4   :  { %s1601_s22 = smov 8   ;;  %s1602_s23 = smov [#allocation4]  }
   0x5   :  { %41 = dma.hbm_to_vmem [thread:$0]  %s34_s15, 512, %s36_s17, [#allocation3], %s1600_s21, %s1600_s21, %s1601_s22  }
   0x6   :  { %s53_s24 = sshll.u32 %s1602_s23, 4  ;;  %s54_s24 = int_to_ptr.vmem [resolvable:$true] %s53_s24 }
   0x7   :  { %56 = dma.hbm_to_vmem [thread:$0]  %s52_s20, 16, %s54_s24, [#allocation5]  }
   0x8   :  { %1595 = dma.done.wait [#allocation3], 512  }
   0x9   :  { %1596 = vsyncadd [#allocation3], 4294966784 }
   0xa   :  { %1597 = dma.done.wait [#allocation5], 16  }
   0xb   :  { %1598 = vsyncadd [#allocation5], 4294967280  ;;  %vm103_vm0 = vcmask 1043456   ;;  %vm78_vm1 = vcmask 31744   ;;  %v73_v0 = vld [vmem:[%s2042_s1] sm:$0xf] }
   0xc   :  { %v65_v1 = vld [vmem:[%s2041_s0] sm:$0xff]  ;;  %1355 = vmatpush.msk.msra.mxu0 %vm103_vm0, %v73_v0  ;;  %s1603_s29 = smov 64   ;;  %s1604_s1 = smov 96   ;;  %v1685_v22 = vld [vmem:[%s2044_s3 + $0x30] sm:$0xff]  ;;  %v1690_v23 = vld [vmem:[%s2044_s3 + $0x38] sm:$0xff]  ;;  %vm198_vm6 = vcmask 261120  }
   0xd   :  { %1356 = vmatmul.msk.f32.vlgmr.msra.gmra.mxu0 %vm78_vm1, %v65_v1  ;;  %v1677_v2 = vld [vmem:[%s2043_s2] ss:$0 sm:$0xff]  ;;  %213 = vmatpush.msra.mxu1 %v1685_v22  ;;  %v1702_v25 = vld [vmem:[%s2044_s3 + $0x28] sm:$0xff]  ;;  %v1707_v26 = vld [vmem:[%s2044_s3 + $0x10] sm:$0xff]  ;;  %s1605_s25 = smov 32  }
   0xe   :  { %v1695_v24 = vld [vmem:[%s2044_s3 + $0x20] sm:$0xff]  ;;  %233 = vmatpush.msra.mxu2 %v1690_v23  ;;  %v1712_v27 = vld [vmem:[%s2044_s3 + $0x18] sm:$0xff]  ;;  %v1724_v29 = vld [vmem:[%s2044_s3 + $0x8] sm:$0xff] }
   0xf   :  { %214 = vmatpush.msra.mxu1 %v1695_v24  ;;  %v1719_v28 = vld [vmem:[%s2044_s3] sm:$0xff]  ;;  %v66_v32 = vld [vmem:[%s2041_s0 + $0x8] sm:$0xff] }
  0x10   :  { %234 = vmatpush.msra.mxu2 %v1702_v25  ;;  %v1756_v34 = vld [vmem:[%s2046_s5] ss:$0 sm:$0xff] }
  0x11   :  { %215 = vmatpush.msra.mxu1 %v1707_v26 }
  0x12   :  { %235 = vmatpush.msra.mxu2 %v1712_v27 }
  0x13   :  { %216 = vmatpush.msra.mxu1 %v1719_v28 }
  0x14   :  { %236 = vmatpush.msra.mxu2 %v1724_v29 }
  0x15   :  { %357 = vmatpush.msrb.mxu1 %v1685_v22  ;;  %1357 = vmatmul.msk.f32.gmra.mxu0 %vm78_vm1, %v66_v32 }
  0x16   :  { %377 = vmatpush.msrb.mxu2 %v1690_v23 }
  0x17   :  { %358 = vmatpush.msrb.mxu1 %v1695_v24 }
  0x18   :  { %378 = vmatpush.msrb.mxu2 %v1702_v25 }
  0x19   :  { %359 = vmatpush.msrb.mxu1 %v1707_v26 }
  0x1a   :  { %379 = vmatpush.msrb.mxu2 %v1712_v27 }
  0x1b   :  { %360 = vmatpush.msrb.mxu1 %v1719_v28 }
  0x1c   :  { %380 = vmatpush.msrb.mxu2 %v1724_v29 }
  0x8a   :  { %v124_v3 = vpop.f32.mrf.mxu0 }
  0x8b   :  { %v125_v4 = vadd.f32 %v1677_v2, %v124_v3 }
  0x8d   :  { %1415 = vtanh.f32 %v125_v4  ;;  %v1364_v6 = vmul.f32 -1.442695, %v125_v4 }
  0x8f   :  { %1417 = vpow2.f32 %v1364_v6 }
  0x92   :  { %v127_v36 = vpop.f32.mrf.mxu0 }
  0x93   :  { %v1416_v5 = vpop.eup %1415  ;;  %v128_v38 = vadd.f32 %v1677_v2, %v127_v36 }
  0x94   :  { %185 = vrot.lane.b32.xlu0 %v1416_v5, %s1603_s29 }
  0x95   :  { %v1418_v7 = vpop.eup %1417 }
  0x96   :  { %v167_v8 = vadd.f32 1.0, %v1418_v7 }
  0x98   :  { %1419 = vrcp.f32 %v167_v8  ;;  %v179_v14 = vand.u32 2147483648, %v167_v8  ;;  %vm173_vm3 = vweird.f32 %v167_v8  ;;  %v177_v15 = vand.u32 2147483647, %v167_v8 }
  0x9a   :  { %v180_v17 = vor.u32 1.1754944e-38, %v179_v14  ;;  %vm178_vm5 = vcmp.eq.f32.partialorder %v177_v15, 8.507059e+37  ;;  %v1773_v14 = vld [vmem:[%s2045_s4 + $0x10] sm:$0xff]  ;;  %v1780_v15 = vld [vmem:[%s2045_s4 + $0x8] sm:$0xff] }
  0x9e   :  { %v1420_v9 = vpop.eup %1419 }
  0x9f   :  { %v169_v10 = vmul.f32 %v1420_v9, %v167_v8  ;;  %vm174_vm2 = vweird.f32 %v1420_v9 }
  0xa0   :  { %vm175_vm4 = vmor %vm173_vm3, %vm174_vm2 }
  0xa1   :  { %v170_v11 = vsub.f32 1.0, %v169_v10 }
  0xa3   :  { %v171_v12 = vmul.f32 %v1420_v9, %v170_v11 }
  0xa5   :  { %v172_v13 = vadd.f32 %v1420_v9, %v171_v12 }
  0xa7   :  { %v176_v16 = vsel %vm175_vm4, %v1420_v9, %v172_v13  ;;  %v1768_v13 = vld [vmem:[%s2045_s4 + $0x18] sm:$0xff] }
  0xa8   :  { %v181_v19 = vsel %vm178_vm5, %v180_v17, %v176_v16  ;;  %290 = vmatpush.msra.mxu3 %v1768_v13  ;;  %v1786_v16 = vld [vmem:[%s2045_s4] sm:$0xff] }
  0xaa   :  { %291 = vmatpush.msra.mxu3 %v1773_v14 }
  0xac   :  { %292 = vmatpush.msra.mxu3 %v1780_v15 }
  0xae   :  { %293 = vmatpush.msra.mxu3 %v1786_v16 }
  0xb0   :  { %444 = vmatpush.msrb.mxu3 %v1768_v13 }
  0xb2   :  { %445 = vmatpush.msrb.mxu3 %v1773_v14 }
  0xb4   :  { %446 = vmatpush.msrb.mxu3 %v1780_v15 }
  0xb6   :  { %447 = vmatpush.msrb.mxu3 %v1786_v16 }
 0x106   :  { %v186_v18 = vpop.permute.xlu0 %185 }
 0x107   :  { %v188_v20 = vmul.f32 %v186_v18, %v181_v19 }
 0x109   :  { %1421 = vtanh.f32 %v188_v20 }
 0x10f   :  { %v1422_v21 = vpop.eup %1421 }
 0x110   :  { %191 = vrot.lane.b32.xlu0 %v1422_v21, %s1604_s1 }
 0x182   :  { %v192_v30 = vpop.permute.xlu0 %191 }
 0x183   :  { %v194_v31 = vmul.f32 %v192_v30, %v181_v19 }
 0x185   :  { %196 = vrot.lane.b32.xlu1 %v194_v31, %s1605_s25 }
 0x1f7   :  { %v197_v33 = vpop.permute.xlu1 %196 }
 0x1f8   :  { %1365 = vmatmul.msk.f32.vlgmr.msra.gmra.mxu1 %vm198_vm6, %v197_v33  ;;  %1366 = vmatmul.msk.f32.vlgmr.msra.gmra.mxu2 %vm198_vm6, %v197_v33  ;;  %v67_v33 = vld [vmem:[%s2041_s0 + $0x10] sm:$0xff] }
 0x1f9   :  { %527 = vmatpush.msra.mxu2 %v1690_v23  ;;  %507 = vmatpush.msra.mxu1 %v1685_v22 }
 0x1fa   :  { %1358 = vmatmul.msk.f32.gmra.mxu0 %vm78_vm1, %v67_v33 }
 0x1fb   :  { %528 = vmatpush.msra.mxu2 %v1702_v25  ;;  %508 = vmatpush.msra.mxu1 %v1695_v24 }
 0x1fd   :  { %529 = vmatpush.msra.mxu2 %v1712_v27  ;;  %509 = vmatpush.msra.mxu1 %v1707_v26 }
 0x1ff   :  { %530 = vmatpush.msra.mxu2 %v1724_v29  ;;  %510 = vmatpush.msra.mxu1 %v1719_v28 }
 0x275   :  { %v218_v35 = vpop.f32.mrf.mxu1 }
 0x276   :  { %v241_v37 = vadd.f32 %v1756_v34, %v218_v35 }
 0x278   :  { %1423 = vtanh.f32 %v241_v37  ;;  %v1367_v43 = vmul.f32 -1.442695, %v241_v37 }
 0x27b   :  { %v238_v39 = vpop.f32.mrf.mxu2 }
 0x27c   :  { %v298_v40 = vadd.f32 %v238_v39, %v128_v38  ;;  %v130_v39 = vpop.f32.mrf.mxu0 }
 0x27e   :  { %v1424_v41 = vpop.eup %1423  ;;  %1425 = vtanh.f32 %v298_v40  ;;  %v1369_v48 = vmul.f32 -1.442695, %v298_v40 }
 0x27f   :  { %263 = vrot.lane.b32.xlu2 %v1424_v41, %s1603_s29  ;;  %1427 = vpow2.f32 %v1367_v43  ;;  %v131_v41 = vadd.f32 %v1677_v2, %v130_v39 }
 0x284   :  { %v1426_v42 = vpop.eup %1425 }
 0x285   :  { %325 = vrot.lane.b32.xlu1 %v1426_v42, %s1603_s29  ;;  %v1428_v44 = vpop.eup %1427 }
 0x286   :  { %v245_v45 = vadd.f32 1.0, %v1428_v44 }
 0x287   :  { %320 = vrot.lane.b32.xlu2 %v188_v20, %s1605_s25 }
 0x288   :  { %1429 = vrcp.f32 %v245_v45  ;;  %v257_v52 = vand.u32 2147483648, %v245_v45  ;;  %vm251_vm8 = vweird.f32 %v245_v45  ;;  %v255_v54 = vand.u32 2147483647, %v245_v45 }
 0x289   :  { %1431 = vpow2.f32 %v1369_v48 }
 0x28a   :  { %v258_v57 = vor.u32 1.1754944e-38, %v257_v52  ;;  %vm256_vm10 = vcmp.eq.f32.partialorder %v255_v54, 8.507059e+37 }
 0x28e   :  { %v1430_v46 = vpop.eup %1429 }
 0x28f   :  { %v247_v47 = vmul.f32 %v1430_v46, %v245_v45  ;;  %vm252_vm7 = vweird.f32 %v1430_v46  ;;  %v1432_v53 = vpop.eup %1431 }
 0x290   :  { %vm253_vm9 = vmor %vm251_vm8, %vm252_vm7  ;;  %v302_v56 = vadd.f32 1.0, %v1432_v53 }
 0x291   :  { %v248_v49 = vsub.f32 1.0, %v247_v47 }
 0x292   :  { %1433 = vrcp.f32 %v302_v56  ;;  %v314_v4 = vand.u32 2147483648, %v302_v56  ;;  %vm308_vm12 = vweird.f32 %v302_v56  ;;  %v312_v5 = vand.u32 2147483647, %v302_v56 }
 0x293   :  { %v249_v50 = vmul.f32 %v1430_v46, %v248_v49 }
 0x294   :  { %v315_v7 = vor.u32 1.1754944e-38, %v314_v4  ;;  %vm313_vm14 = vcmp.eq.f32.partialorder %v312_v5, 8.507059e+37 }
 0x295   :  { %v250_v51 = vadd.f32 %v1430_v46, %v249_v50 }
 0x297   :  { %v254_v55 = vsel %vm253_vm9, %v1430_v46, %v250_v51 }
 0x298   :  { %v259_v59 = vsel %vm256_vm10, %v258_v57, %v254_v55  ;;  %v1434_v61 = vpop.eup %1433 }
 0x299   :  { %v304_v63 = vmul.f32 %v1434_v61, %v302_v56  ;;  %vm309_vm11 = vweird.f32 %v1434_v61 }
 0x29a   :  { %vm310_vm13 = vmor %vm308_vm12, %vm309_vm11 }
 0x29b   :  { %v305_v0 = vsub.f32 1.0, %v304_v63 }
 0x29d   :  { %v306_v1 = vmul.f32 %v1434_v61, %v305_v0 }
 0x29f   :  { %v307_v3 = vadd.f32 %v1434_v61, %v306_v1 }
 0x2a1   :  { %v311_v6 = vsel %vm310_vm13, %v1434_v61, %v307_v3 }
 0x2a2   :  { %v316_v8 = vsel %vm313_vm14, %v315_v7, %v311_v6 }
 0x2d9   :  { %v264_v58 = vpop.permute.xlu2 %263 }
 0x2da   :  { %v266_v60 = vmul.f32 %v264_v58, %v259_v59 }
 0x2dc   :  { %1435 = vtanh.f32 %v266_v60 }
 0x2e1   :  { %v321_v17 = vpop.permute.xlu2 %320 }
 0x2e2   :  { %v1436_v62 = vpop.eup %1435  ;;  %v323_v18 = vmul.f32 %v321_v17, %v316_v8 }
 0x2e3   :  { %269 = vrot.lane.b32.xlu1 %v1436_v62, %s1604_s1 }
 0x2f7   :  { %v326_v9 = vpop.permute.xlu1 %325 }
 0x2f8   :  { %v328_v10 = vmul.f32 %v326_v9, %v316_v8 }
 0x2fa   :  { %330 = vrot.lane.b32.xlu0 %v328_v10, %s1605_s25 }
 0x355   :  { %v270_v11 = vpop.permute.xlu1 %269 }
 0x356   :  { %v272_v12 = vmul.f32 %v270_v11, %v259_v59 }
 0x358   :  { %274 = vrot.lane.b32.xlu0 %v272_v12, %s1605_s25 }
 0x36c   :  { %v331_v19 = vpop.permute.xlu0 %330 }
 0x36d   :  { %v1794_v20 = vadd.f32 %v331_v19, %v323_v18 }
 0x36f   :  { %1437 = vtanh.f32 %v1794_v20 }
 0x375   :  { %v1438_v21 = vpop.eup %1437 }
 0x376   :  { %336 = vrot.lane.b32.xlu2 %v1438_v21, %s1603_s29 }
 0x3ca   :  { %v275_v30 = vpop.permute.xlu0 %274 }
 0x3cb   :  { %1368 = vmatmul.msk.f32.vlgmr.msra.gmra.mxu3 %vm198_vm6, %v275_v30 }
 0x3cc   :  { %590 = vmatpush.msra.mxu3 %v1768_v13 }
 0x3ce   :  { %591 = vmatpush.msra.mxu3 %v1773_v14 }
 0x3d0   :  { %v337_v31 = vpop.permute.xlu2 %336  ;;  %592 = vmatpush.msra.mxu3 %v1780_v15 }
 0x3d1   :  { %v339_v32 = vmul.f32 %v337_v31, %v316_v8 }
 0x3d2   :  { %593 = vmatpush.msra.mxu3 %v1786_v16 }
 0x3d3   :  { %341 = vrot.lane.b32.xlu1 %v339_v32, %s1605_s25 }
 0x3db   :  { %407 = vrot.lane.b32.xlu1 %v266_v60, %s1605_s25 }
 0x445   :  { %v342_v35 = vpop.permute.xlu1 %341 }
 0x446   :  { %1370 = vmatmul.msk.f32.vlgmr.msrb.gmra.mxu1 %vm198_vm6, %v342_v35  ;;  %1371 = vmatmul.msk.f32.vlgmr.msrb.gmra.mxu2 %vm198_vm6, %v342_v35 }
 0x447   :  { %653 = vmatpush.msrb.mxu1 %v1685_v22  ;;  %673 = vmatpush.msrb.mxu2 %v1690_v23 }
 0x449   :  { %654 = vmatpush.msrb.mxu1 %v1695_v24  ;;  %674 = vmatpush.msrb.mxu2 %v1702_v25 }
 0x44b   :  { %655 = vmatpush.msrb.mxu1 %v1707_v26  ;;  %675 = vmatpush.msrb.mxu2 %v1712_v27 }
 0x44d   :  { %656 = vmatpush.msrb.mxu1 %v1719_v28  ;;  %676 = vmatpush.msrb.mxu2 %v1724_v29  ;;  %v408_v17 = vpop.permute.xlu1 %407 }
 0x44e   :  { %v295_v36 = vpop.f32.mrf.mxu3 }
 0x44f   :  { %v296_v37 = vadd.f32 %v1756_v34, %v295_v36 }
 0x4c3   :  { %v362_v38 = vpop.f32.mrf.mxu1 }
 0x4c4   :  { %v385_v40 = vadd.f32 %v362_v38, %v296_v37 }
 0x4c6   :  { %1439 = vtanh.f32 %v385_v40  ;;  %v1372_v46 = vmul.f32 -1.442695, %v385_v40 }
 0x4c9   :  { %v382_v42 = vpop.f32.mrf.mxu2 }
 0x4ca   :  { %v452_v43 = vadd.f32 %v382_v42, %v131_v41 }
 0x4cc   :  { %v1440_v44 = vpop.eup %1439  ;;  %1441 = vtanh.f32 %v452_v43  ;;  %v1374_v51 = vmul.f32 -1.442695, %v452_v43 }
 0x4cd   :  { %412 = vrot.lane.b32.xlu2 %v1440_v44, %s1603_s29  ;;  %1443 = vpow2.f32 %v1372_v46 }
 0x4d2   :  { %v1442_v45 = vpop.eup %1441 }
 0x4d3   :  { %475 = vrot.lane.b32.xlu0 %v1442_v45, %s1603_s29  ;;  %v1444_v47 = vpop.eup %1443 }
 0x4d4   :  { %v389_v48 = vadd.f32 1.0, %v1444_v47 }
 0x4d6   :  { %1445 = vrcp.f32 %v389_v48  ;;  %v401_v55 = vand.u32 2147483648, %v389_v48  ;;  %vm395_vm0 = vweird.f32 %v389_v48  ;;  %v399_v57 = vand.u32 2147483647, %v389_v48 }
 0x4d7   :  { %1447 = vpow2.f32 %v1374_v51 }
 0x4d8   :  { %v402_v60 = vor.u32 1.1754944e-38, %v401_v55  ;;  %vm400_vm3 = vcmp.eq.f32.partialorder %v399_v57, 8.507059e+37 }
 0x4dc   :  { %v1446_v49 = vpop.eup %1445 }
 0x4dd   :  { %v391_v50 = vmul.f32 %v1446_v49, %v389_v48  ;;  %vm396_vm15 = vweird.f32 %v1446_v49  ;;  %v1448_v56 = vpop.eup %1447 }
 0x4de   :  { %vm397_vm2 = vmor %vm395_vm0, %vm396_vm15  ;;  %v456_v59 = vadd.f32 1.0, %v1448_v56 }
 0x4df   :  { %v392_v52 = vsub.f32 1.0, %v391_v50 }
 0x4e0   :  { %1449 = vrcp.f32 %v456_v59  ;;  %v468_v6 = vand.u32 2147483648, %v456_v59  ;;  %vm462_vm5 = vweird.f32 %v456_v59  ;;  %v466_v7 = vand.u32 2147483647, %v456_v59 }
 0x4e1   :  { %v393_v53 = vmul.f32 %v1446_v49, %v392_v52 }
 0x4e2   :  { %v469_v9 = vor.u32 1.1754944e-38, %v468_v6  ;;  %vm467_vm8 = vcmp.eq.f32.partialorder %v466_v7, 8.507059e+37 }
 0x4e3   :  { %v394_v54 = vadd.f32 %v1446_v49, %v393_v53 }
 0x4e5   :  { %v398_v58 = vsel %vm397_vm2, %v1446_v49, %v394_v54 }
 0x4e6   :  { %v403_v62 = vsel %vm400_vm3, %v402_v60, %v398_v58  ;;  %v1450_v0 = vpop.eup %1449 }
 0x4e7   :  { %v458_v1 = vmul.f32 %v1450_v0, %v456_v59  ;;  %vm463_vm4 = vweird.f32 %v1450_v0  ;;  %v410_v18 = vmul.f32 %v408_v17, %v403_v62 }
 0x4e8   :  { %vm464_vm7 = vmor %vm462_vm5, %vm463_vm4 }
 0x4e9   :  { %v459_v3 = vsub.f32 1.0, %v458_v1 }
 0x4eb   :  { %v460_v4 = vmul.f32 %v1450_v0, %v459_v3 }
 0x4ed   :  { %v461_v5 = vadd.f32 %v1450_v0, %v460_v4 }
 0x4ef   :  { %v465_v8 = vsel %vm464_vm7, %v1450_v0, %v461_v5 }
 0x4f0   :  { %v470_v11 = vsel %vm467_vm8, %v469_v9, %v465_v8 }
 0x4f1   :  { %v473_v31 = vmul.f32 %v470_v11, %v1794_v20  ;;  %v68_v20 = vld [vmem:[%s2041_s0 + $0x18] sm:$0xff] }
 0x4f2   :  { %1359 = vmatmul.msk.f32.gmra.mxu0 %vm78_vm1, %v68_v20 }
 0x527   :  { %v413_v61 = vpop.permute.xlu2 %412 }
 0x528   :  { %v415_v63 = vmul.f32 %v413_v61, %v403_v62 }
 0x52a   :  { %417 = vrot.lane.b32.xlu2 %v415_v63, %s1605_s25 }
 0x545   :  { %v476_v10 = vpop.permute.xlu0 %475 }
 0x546   :  { %v478_v12 = vmul.f32 %v476_v10, %v470_v11 }
 0x548   :  { %480 = vrot.lane.b32.xlu0 %v478_v12, %s1605_s25 }
 0x56f   :  { %v133_v45 = vpop.f32.mrf.mxu0 }
 0x570   :  { %v134_v47 = vadd.f32 %v1677_v2, %v133_v45 }
 0x584   :  { %v418_v19 = vpop.permute.xlu2 %417 }
 0x585   :  { %v1825_v21 = vadd.f32 %v418_v19, %v410_v18 }
 0x587   :  { %1451 = vtanh.f32 %v1825_v21 }
 0x58d   :  { %v1452_v30 = vpop.eup %1451 }
 0x58e   :  { %423 = vrot.lane.b32.xlu1 %v1452_v30, %s1603_s29 }
 0x5ba   :  { %v481_v32 = vpop.permute.xlu0 %480 }
 0x5bb   :  { %v1830_v33 = vadd.f32 %v481_v32, %v473_v31 }
 0x5bd   :  { %1453 = vtanh.f32 %v1830_v33 }
 0x5c3   :  { %v1454_v35 = vpop.eup %1453 }
 0x5c4   :  { %486 = vrot.lane.b32.xlu2 %v1454_v35, %s1603_s29 }
 0x600   :  { %v424_v36 = vpop.permute.xlu1 %423 }
 0x601   :  { %v426_v37 = vmul.f32 %v424_v36, %v403_v62 }
 0x603   :  { %428 = vrot.lane.b32.xlu0 %v426_v37, %s1605_s25 }
 0x61e   :  { %v487_v38 = vpop.permute.xlu2 %486 }
 0x61f   :  { %v489_v39 = vmul.f32 %v487_v38, %v470_v11 }
 0x621   :  { %491 = vrot.lane.b32.xlu1 %v489_v39, %s1605_s25 }
 0x675   :  { %v429_v40 = vpop.permute.xlu0 %428 }
 0x676   :  { %1373 = vmatmul.msk.f32.vlgmr.msrb.gmra.mxu3 %vm198_vm6, %v429_v40 }
 0x677   :  { %736 = vmatpush.msrb.mxu3 %v1768_v13 }
 0x679   :  { %737 = vmatpush.msrb.mxu3 %v1773_v14 }
 0x67b   :  { %738 = vmatpush.msrb.mxu3 %v1780_v15 }
 0x67d   :  { %739 = vmatpush.msrb.mxu3 %v1786_v16 }
 0x693   :  { %v492_v41 = vpop.permute.xlu1 %491 }
 0x694   :  { %1375 = vmatmul.msk.f32.vlgmr.msra.gmra.mxu1 %vm198_vm6, %v492_v41  ;;  %1376 = vmatmul.msk.f32.vlgmr.msra.gmra.mxu2 %vm198_vm6, %v492_v41 }
 0x695   :  { %799 = vmatpush.msra.mxu1 %v1685_v22  ;;  %819 = vmatpush.msra.mxu2 %v1690_v23 }
 0x697   :  { %800 = vmatpush.msra.mxu1 %v1695_v24  ;;  %820 = vmatpush.msra.mxu2 %v1702_v25 }
 0x699   :  { %801 = vmatpush.msra.mxu1 %v1707_v26  ;;  %821 = vmatpush.msra.mxu2 %v1712_v27 }
 0x69b   :  { %802 = vmatpush.msra.mxu1 %v1719_v28  ;;  %822 = vmatpush.msra.mxu2 %v1724_v29 }
 0x6f9   :  { %v449_v42 = vpop.f32.mrf.mxu3 }
 0x6fa   :  { %v450_v43 = vadd.f32 %v1756_v34, %v449_v42 }
 0x711   :  { %v512_v44 = vpop.f32.mrf.mxu1 }
 0x712   :  { %v535_v46 = vadd.f32 %v512_v44, %v450_v43 }
 0x714   :  { %1455 = vtanh.f32 %v535_v46  ;;  %v1377_v52 = vmul.f32 -1.442695, %v535_v46 }
 0x717   :  { %v532_v48 = vpop.f32.mrf.mxu2 }
 0x718   :  { %v598_v49 = vadd.f32 %v532_v48, %v134_v47 }
 0x71a   :  { %v1456_v50 = vpop.eup %1455  ;;  %1457 = vtanh.f32 %v598_v49  ;;  %v1379_v57 = vmul.f32 -1.442695, %v598_v49 }
 0x71b   :  { %558 = vrot.lane.b32.xlu2 %v1456_v50, %s1603_s29  ;;  %1459 = vpow2.f32 %v1377_v52 }
 0x720   :  { %v1458_v51 = vpop.eup %1457 }
 0x721   :  { %621 = vrot.lane.b32.xlu0 %v1458_v51, %s1603_s29  ;;  %v1460_v53 = vpop.eup %1459 }
 0x722   :  { %v539_v54 = vadd.f32 1.0, %v1460_v53 }
 0x724   :  { %1461 = vrcp.f32 %v539_v54  ;;  %v551_v61 = vand.u32 2147483648, %v539_v54  ;;  %vm545_vm10 = vweird.f32 %v539_v54  ;;  %v549_v63 = vand.u32 2147483647, %v539_v54 }
 0x725   :  { %1463 = vpow2.f32 %v1379_v57 }
 0x726   :  { %v552_v3 = vor.u32 1.1754944e-38, %v551_v61  ;;  %vm550_vm12 = vcmp.eq.f32.partialorder %v549_v63, 8.507059e+37 }
 0x72a   :  { %v1462_v55 = vpop.eup %1461 }
 0x72b   :  { %v541_v56 = vmul.f32 %v1462_v55, %v539_v54  ;;  %vm546_vm9 = vweird.f32 %v1462_v55  ;;  %v1464_v62 = vpop.eup %1463 }
 0x72c   :  { %vm547_vm11 = vmor %vm545_vm10, %vm546_vm9  ;;  %v602_v1 = vadd.f32 1.0, %v1464_v62 }
 0x72d   :  { %v542_v58 = vsub.f32 1.0, %v541_v56 }
 0x72e   :  { %1465 = vrcp.f32 %v602_v1  ;;  %v614_v12 = vand.u32 2147483648, %v602_v1  ;;  %vm608_vm14 = vweird.f32 %v602_v1  ;;  %v612_v17 = vand.u32 2147483647, %v602_v1 }
 0x72f   :  { %v543_v59 = vmul.f32 %v1462_v55, %v542_v58 }
 0x730   :  { %v615_v19 = vor.u32 1.1754944e-38, %v614_v12  ;;  %vm613_vm0 = vcmp.eq.f32.partialorder %v612_v17, 8.507059e+37 }
 0x731   :  { %v544_v60 = vadd.f32 %v1462_v55, %v543_v59 }
 0x733   :  { %v548_v0 = vsel %vm547_vm11, %v1462_v55, %v544_v60 }
 0x734   :  { %v553_v5 = vsel %vm550_vm12, %v552_v3, %v548_v0  ;;  %v1466_v7 = vpop.eup %1465 }
 0x735   :  { %v604_v8 = vmul.f32 %v1466_v7, %v602_v1  ;;  %vm609_vm13 = vweird.f32 %v1466_v7  ;;  %v556_v35 = vmul.f32 %v553_v5, %v1825_v21 }
 0x736   :  { %vm610_vm15 = vmor %vm608_vm14, %vm609_vm13 }
 0x737   :  { %v605_v9 = vsub.f32 1.0, %v604_v8 }
 0x739   :  { %v606_v10 = vmul.f32 %v1466_v7, %v605_v9 }
 0x73b   :  { %v607_v11 = vadd.f32 %v1466_v7, %v606_v10 }
 0x73d   :  { %v611_v18 = vsel %vm610_vm15, %v1466_v7, %v607_v11 }
 0x73e   :  { %v616_v31 = vsel %vm613_vm0, %v615_v19, %v611_v18 }
 0x73f   :  { %v619_v38 = vmul.f32 %v616_v31, %v1830_v33  ;;  %v69_v33 = vld [vmem:[%s2041_s0 + $0x20] sm:$0xff] }
 0x740   :  { %1360 = vmatmul.msk.f32.gmra.mxu0 %vm78_vm1, %v69_v33 }
 0x775   :  { %v559_v4 = vpop.permute.xlu2 %558 }
 0x776   :  { %v561_v6 = vmul.f32 %v559_v4, %v553_v5 }
 0x778   :  { %563 = vrot.lane.b32.xlu1 %v561_v6, %s1605_s25 }
 0x793   :  { %v622_v30 = vpop.permute.xlu0 %621 }
 0x794   :  { %v624_v32 = vmul.f32 %v622_v30, %v616_v31 }
 0x796   :  { %626 = vrot.lane.b32.xlu2 %v624_v32, %s1605_s25 }
 0x7bd   :  { %v136_v50 = vpop.f32.mrf.mxu0 }
 0x7be   :  { %v137_v52 = vadd.f32 %v1677_v2, %v136_v50 }
 0x7ea   :  { %v564_v36 = vpop.permute.xlu1 %563 }
 0x7eb   :  { %v1862_v37 = vadd.f32 %v564_v36, %v556_v35 }
 0x7ed   :  { %1467 = vtanh.f32 %v1862_v37 }
 0x7f0   :  { %v627_v39 = vpop.permute.xlu2 %626 }
 0x7f1   :  { %v1866_v20 = vadd.f32 %v627_v39, %v619_v38 }
 0x7f3   :  { %v1468_v40 = vpop.eup %1467  ;;  %1469 = vtanh.f32 %v1866_v20 }
 0x7f4   :  { %569 = vrot.lane.b32.xlu0 %v1468_v40, %s1603_s29 }
 0x7f9   :  { %v1470_v41 = vpop.eup %1469 }
 0x7fa   :  { %632 = vrot.lane.b32.xlu1 %v1470_v41, %s1603_s29 }
 0x866   :  { %v570_v42 = vpop.permute.xlu0 %569 }
 0x867   :  { %v572_v21 = vmul.f32 %v570_v42, %v553_v5 }
 0x869   :  { %574 = vrot.lane.b32.xlu2 %v572_v21, %s1605_s25 }
 0x86c   :  { %v633_v43 = vpop.permute.xlu1 %632 }
 0x86d   :  { %v635_v44 = vmul.f32 %v633_v43, %v616_v31 }
 0x86f   :  { %637 = vrot.lane.b32.xlu0 %v635_v44, %s1605_s25 }
 0x8c3   :  { %v575_v45 = vpop.permute.xlu2 %574 }
 0x8c4   :  { %1378 = vmatmul.msk.f32.vlgmr.msra.gmra.mxu3 %vm198_vm6, %v575_v45 }
 0x8c5   :  { %882 = vmatpush.msra.mxu3 %v1768_v13 }
 0x8c7   :  { %883 = vmatpush.msra.mxu3 %v1773_v14 }
 0x8c9   :  { %884 = vmatpush.msra.mxu3 %v1780_v15 }
 0x8cb   :  { %885 = vmatpush.msra.mxu3 %v1786_v16 }
 0x8e1   :  { %v638_v46 = vpop.permute.xlu0 %637 }
 0x8e2   :  { %1380 = vmatmul.msk.f32.vlgmr.msrb.gmra.mxu1 %vm198_vm6, %v638_v46  ;;  %1381 = vmatmul.msk.f32.vlgmr.msrb.gmra.mxu2 %vm198_vm6, %v638_v46 }
 0x8e3   :  { %945 = vmatpush.msrb.mxu1 %v1685_v22  ;;  %965 = vmatpush.msrb.mxu2 %v1690_v23 }
 0x8e5   :  { %946 = vmatpush.msrb.mxu1 %v1695_v24  ;;  %966 = vmatpush.msrb.mxu2 %v1702_v25 }
 0x8e7   :  { %947 = vmatpush.msrb.mxu1 %v1707_v26  ;;  %967 = vmatpush.msrb.mxu2 %v1712_v27 }
 0x8e9   :  { %948 = vmatpush.msrb.mxu1 %v1719_v28  ;;  %968 = vmatpush.msrb.mxu2 %v1724_v29 }
 0x947   :  { %v595_v47 = vpop.f32.mrf.mxu3 }
 0x948   :  { %v596_v48 = vadd.f32 %v1756_v34, %v595_v47 }
 0x95f   :  { %v658_v49 = vpop.f32.mrf.mxu1 }
 0x960   :  { %v681_v51 = vadd.f32 %v658_v49, %v596_v48 }
 0x962   :  { %1471 = vtanh.f32 %v681_v51  ;;  %v1382_v60 = vmul.f32 -1.442695, %v681_v51 }
 0x965   :  { %v678_v53 = vpop.f32.mrf.mxu2 }
 0x966   :  { %v744_v54 = vadd.f32 %v678_v53, %v137_v52 }
 0x968   :  { %v1472_v55 = vpop.eup %1471  ;;  %1473 = vtanh.f32 %v744_v54  ;;  %v1384_v57 = vmul.f32 -1.442695, %v744_v54 }
 0x969   :  { %704 = vrot.lane.b32.xlu1 %v1472_v55, %s1603_s29 }
 0x96a   :  { %1475 = vpow2.f32 %v1384_v57 }
 0x96e   :  { %v1474_v56 = vpop.eup %1473 }
 0x96f   :  { %767 = vrot.lane.b32.xlu2 %v1474_v56, %s1603_s29 }
 0x970   :  { %v1476_v58 = vpop.eup %1475 }
 0x971   :  { %v748_v59 = vadd.f32 1.0, %v1476_v58 }
 0x973   :  { %1477 = vrcp.f32 %v748_v59  ;;  %v760_v5 = vand.u32 2147483648, %v748_v59  ;;  %vm754_vm3 = vweird.f32 %v748_v59  ;;  %v758_v6 = vand.u32 2147483647, %v748_v59 }
 0x974   :  { %1479 = vpow2.f32 %v1382_v60 }
 0x975   :  { %v761_v9 = vor.u32 1.1754944e-38, %v760_v5  ;;  %vm759_vm5 = vcmp.eq.f32.partialorder %v758_v6, 8.507059e+37 }
 0x979   :  { %v1478_v61 = vpop.eup %1477 }
 0x97a   :  { %v750_v62 = vmul.f32 %v1478_v61, %v748_v59  ;;  %v1480_v63 = vpop.eup %1479  ;;  %vm755_vm2 = vweird.f32 %v1478_v61 }
 0x97b   :  { %v685_v1 = vadd.f32 1.0, %v1480_v63  ;;  %vm756_vm4 = vmor %vm754_vm3, %vm755_vm2 }
 0x97c   :  { %v751_v0 = vsub.f32 1.0, %v750_v62 }
 0x97d   :  { %1481 = vrcp.f32 %v685_v1  ;;  %v697_v31 = vand.u32 2147483648, %v685_v1  ;;  %vm691_vm8 = vweird.f32 %v685_v1  ;;  %v695_v32 = vand.u32 2147483647, %v685_v1 }
 0x97e   :  { %v752_v3 = vmul.f32 %v1478_v61, %v751_v0 }
 0x97f   :  { %v698_v36 = vor.u32 1.1754944e-38, %v697_v31  ;;  %vm696_vm10 = vcmp.eq.f32.partialorder %v695_v32, 8.507059e+37 }
 0x980   :  { %v753_v4 = vadd.f32 %v1478_v61, %v752_v3 }
 0x982   :  { %v757_v8 = vsel %vm756_vm4, %v1478_v61, %v753_v4 }
 0x983   :  { %v1482_v7 = vpop.eup %1481  ;;  %v762_v12 = vsel %vm759_vm5, %v761_v9, %v757_v8 }
 0x984   :  { %v687_v10 = vmul.f32 %v1482_v7, %v685_v1  ;;  %vm692_vm7 = vweird.f32 %v1482_v7  ;;  %v765_v41 = vmul.f32 %v762_v12, %v1866_v20 }
 0x985   :  { %vm693_vm9 = vmor %vm691_vm8, %vm692_vm7 }
 0x986   :  { %v688_v18 = vsub.f32 1.0, %v687_v10 }
 0x988   :  { %v689_v19 = vmul.f32 %v1482_v7, %v688_v18 }
 0x98a   :  { %v690_v30 = vadd.f32 %v1482_v7, %v689_v19 }
 0x98c   :  { %v694_v35 = vsel %vm693_vm9, %v1482_v7, %v690_v30 }
 0x98d   :  { %v699_v39 = vsel %vm696_vm10, %v698_v36, %v694_v35 }
 0x98e   :  { %v702_v44 = vmul.f32 %v699_v39, %v1862_v37  ;;  %v70_v37 = vld [vmem:[%s2041_s0 + $0x28] sm:$0xff] }
 0x98f   :  { %1361 = vmatmul.msk.f32.gmra.mxu0 %vm78_vm1, %v70_v37  ;;  %v1543_v37 = vld [vmem:[%s2044_s3 + $0x30] sm:$0xff] }
 0x9c9   :  { %v768_v11 = vpop.permute.xlu2 %767 }
 0x9ca   :  { %v770_v17 = vmul.f32 %v768_v11, %v762_v12 }
 0x9cc   :  { %772 = vrot.lane.b32.xlu1 %v770_v17, %s1605_s25 }
 0x9db   :  { %v705_v38 = vpop.permute.xlu1 %704 }
 0x9dc   :  { %v707_v40 = vmul.f32 %v705_v38, %v699_v39 }
 0x9de   :  { %709 = vrot.lane.b32.xlu0 %v707_v40, %s1605_s25 }
 0xa3e   :  { %v773_v42 = vpop.permute.xlu1 %772 }
 0xa3f   :  { %v1899_v21 = vadd.f32 %v773_v42, %v765_v41 }
 0xa41   :  { %1483 = vtanh.f32 %v1899_v21 }
 0xa47   :  { %v1484_v43 = vpop.eup %1483 }
 0xa48   :  { %778 = vrot.lane.b32.xlu0 %v1484_v43, %s1603_s29 }
 0xa50   :  { %v710_v33 = vpop.permute.xlu0 %709 }
 0xa51   :  { %v1904_v45 = vadd.f32 %v710_v33, %v702_v44 }
 0xa53   :  { %1485 = vtanh.f32 %v1904_v45 }
 0xa59   :  { %v1486_v46 = vpop.eup %1485 }
 0xa5a   :  { %715 = vrot.lane.b32.xlu2 %v1486_v46, %s1603_s29 }
 0xab4   :  { %v716_v47 = vpop.permute.xlu2 %715 }
 0xab5   :  { %v718_v20 = vmul.f32 %v716_v47, %v699_v39 }
 0xab7   :  { %720 = vrot.lane.b32.xlu1 %v718_v20, %s1605_s25 }
 0xaba   :  { %v779_v48 = vpop.permute.xlu0 %778 }
 0xabb   :  { %v781_v49 = vmul.f32 %v779_v48, %v762_v12 }
 0xabd   :  { %783 = vrot.lane.b32.xlu2 %v781_v49, %s1605_s25 }
 0xb17   :  { %v784_v50 = vpop.permute.xlu2 %783 }
 0xb18   :  { %1385 = vmatmul.msk.f32.vlgmr.msra.gmra.mxu1 %vm198_vm6, %v784_v50  ;;  %1386 = vmatmul.msk.f32.vlgmr.msra.gmra.mxu2 %vm198_vm6, %v784_v50  ;;  %v1544_v50 = vld [vmem:[%s2044_s3 + $0x20] sm:$0xff] }
 0xb19   :  { %1091 = vmatpush.msra.mxu1 %v1685_v22  ;;  %1111 = vmatpush.msra.mxu2 %v1690_v23  ;;  %v139_v22 = vpop.f32.mrf.mxu0 }
 0xb1a   :  { %v140_v23 = vadd.f32 %v1677_v2, %v139_v22 }
 0xb1b   :  { %1092 = vmatpush.msra.mxu1 %v1695_v24  ;;  %1112 = vmatpush.msra.mxu2 %v1702_v25 }
 0xb1d   :  { %1093 = vmatpush.msra.mxu1 %v1707_v26  ;;  %1113 = vmatpush.msra.mxu2 %v1712_v27 }
 0xb1f   :  { %1094 = vmatpush.msra.mxu1 %v1719_v28  ;;  %1114 = vmatpush.msra.mxu2 %v1724_v29 }
 0xb29   :  { %v721_v51 = vpop.permute.xlu1 %720 }
 0xb2a   :  { %1383 = vmatmul.msk.f32.vlgmr.msrb.gmra.mxu3 %vm198_vm6, %v721_v51 }
 0xb2b   :  { %1028 = vmatpush.msrb.mxu3 %v1768_v13 }
 0xb2d   :  { %1029 = vmatpush.msrb.mxu3 %v1773_v14 }
 0xb2f   :  { %1030 = vmatpush.msrb.mxu3 %v1780_v15 }
 0xb31   :  { %1031 = vmatpush.msrb.mxu3 %v1786_v16 }
 0xb95   :  { %v804_v53 = vpop.f32.mrf.mxu1 }
 0xb9b   :  { %v824_v24 = vpop.f32.mrf.mxu2 }
 0xb9c   :  { %v890_v25 = vadd.f32 %v824_v24, %v140_v23  ;;  %v1969_v23 = vld [vmem:[%s2043_s2] ss:$0 sm:$0xff] }
 0xb9e   :  { %1487 = vtanh.f32 %v890_v25  ;;  %v1389_v56 = vmul.f32 -1.442695, %v890_v25 }
 0xba4   :  { %v1488_v27 = vpop.eup %1487 }
 0xba5   :  { %913 = vrot.lane.b32.xlu1 %v1488_v27, %s1603_s29 }
 0xbad   :  { %v741_v29 = vpop.f32.mrf.mxu3 }
 0xbae   :  { %v742_v52 = vadd.f32 %v1756_v34, %v741_v29 }
 0xbb0   :  { %v827_v54 = vadd.f32 %v804_v53, %v742_v52 }
 0xbb2   :  { %1489 = vtanh.f32 %v827_v54  ;;  %v1387_v2 = vmul.f32 -1.442695, %v827_v54 }
 0xbb3   :  { %1491 = vpow2.f32 %v1389_v56 }
 0xbb8   :  { %v1490_v55 = vpop.eup %1489 }
 0xbb9   :  { %850 = vrot.lane.b32.xlu0 %v1490_v55, %s1603_s29  ;;  %v1492_v57 = vpop.eup %1491 }
 0xbba   :  { %v894_v58 = vadd.f32 1.0, %v1492_v57 }
 0xbbc   :  { %1493 = vrcp.f32 %v894_v58  ;;  %v906_v3 = vand.u32 2147483648, %v894_v58  ;;  %vm900_vm12 = vweird.f32 %v894_v58  ;;  %v904_v4 = vand.u32 2147483647, %v894_v58 }
 0xbbd   :  { %1495 = vpow2.f32 %v1387_v2 }
 0xbbe   :  { %v907_v7 = vor.u32 1.1754944e-38, %v906_v3  ;;  %vm905_vm14 = vcmp.eq.f32.partialorder %v904_v4, 8.507059e+37 }
 0xbc2   :  { %v1494_v59 = vpop.eup %1493 }
 0xbc3   :  { %v896_v60 = vmul.f32 %v1494_v59, %v894_v58  ;;  %v1496_v61 = vpop.eup %1495  ;;  %vm901_vm11 = vweird.f32 %v1494_v59 }
 0xbc4   :  { %v831_v63 = vadd.f32 1.0, %v1496_v61  ;;  %vm902_vm13 = vmor %vm900_vm12, %vm901_vm11 }
 0xbc5   :  { %v897_v62 = vsub.f32 1.0, %v896_v60 }
 0xbc6   :  { %1497 = vrcp.f32 %v831_v63  ;;  %v843_v19 = vand.u32 2147483648, %v831_v63  ;;  %vm837_vm0 = vweird.f32 %v831_v63  ;;  %v841_v30 = vand.u32 2147483647, %v831_v63 }
 0xbc7   :  { %v898_v0 = vmul.f32 %v1494_v59, %v897_v62 }
 0xbc8   :  { %v844_v32 = vor.u32 1.1754944e-38, %v843_v19  ;;  %vm842_vm3 = vcmp.eq.f32.partialorder %v841_v30, 8.507059e+37 }
 0xbc9   :  { %v899_v1 = vadd.f32 %v1494_v59, %v898_v0 }
 0xbcb   :  { %v903_v5 = vsel %vm902_vm13, %v1494_v59, %v899_v1 }
 0xbcc   :  { %v1498_v6 = vpop.eup %1497  ;;  %v908_v9 = vsel %vm905_vm14, %v907_v7, %v903_v5 }
 0xbcd   :  { %v833_v11 = vmul.f32 %v1498_v6, %v831_v63  ;;  %vm838_vm15 = vweird.f32 %v1498_v6  ;;  %v911_v42 = vmul.f32 %v908_v9, %v1899_v21  ;;  %v71_v21 = vld [vmem:[%s2041_s0 + $0x30] sm:$0xff] }
 0xbce   :  { %vm839_vm2 = vmor %vm837_vm0, %vm838_vm15  ;;  %1362 = vmatmul.msk.f32.gmra.mxu0 %vm78_vm1, %v71_v21  ;;  %v2000_v21 = vld [vmem:[%s2046_s5] ss:$0 sm:$0xff] }
 0xbcf   :  { %v834_v12 = vsub.f32 1.0, %v833_v11 }
 0xbd1   :  { %v835_v17 = vmul.f32 %v1498_v6, %v834_v12 }
 0xbd3   :  { %v836_v18 = vadd.f32 %v1498_v6, %v835_v17 }
 0xbd5   :  { %v840_v31 = vsel %vm839_vm2, %v1498_v6, %v836_v18 }
 0xbd6   :  { %v845_v36 = vsel %vm842_vm3, %v844_v32, %v840_v31 }
 0xbd7   :  { %v848_v39 = vmul.f32 %v845_v36, %v1904_v45 }
 0xc17   :  { %v914_v8 = vpop.permute.xlu1 %913 }
 0xc18   :  { %v916_v10 = vmul.f32 %v914_v8, %v908_v9 }
 0xc1a   :  { %918 = vrot.lane.b32.xlu0 %v916_v10, %s1605_s25 }
 0xc2b   :  { %v851_v35 = vpop.permute.xlu0 %850 }
 0xc2c   :  { %v853_v38 = vmul.f32 %v851_v35, %v845_v36 }
 0xc2e   :  { %855 = vrot.lane.b32.xlu2 %v853_v38, %s1605_s25 }
 0xc4b   :  { %v142_v22 = vpop.f32.mrf.mxu0 }
 0xc88   :  { %v856_v40 = vpop.permute.xlu2 %855 }
 0xc89   :  { %v1936_v41 = vadd.f32 %v856_v40, %v848_v39 }
 0xc8b   :  { %1499 = vtanh.f32 %v1936_v41 }
 0xc8c   :  { %v919_v43 = vpop.permute.xlu0 %918 }
 0xc8d   :  { %v1940_v44 = vadd.f32 %v919_v43, %v911_v42 }
 0xc8f   :  { %1501 = vtanh.f32 %v1940_v44 }
 0xc91   :  { %v1500_v33 = vpop.eup %1499 }
 0xc92   :  { %861 = vrot.lane.b32.xlu1 %v1500_v33, %s1603_s29 }
 0xc95   :  { %v1502_v46 = vpop.eup %1501 }
 0xc96   :  { %924 = vrot.lane.b32.xlu2 %v1502_v46, %s1603_s29 }
 0xcf0   :  { %v925_v47 = vpop.permute.xlu2 %924 }
 0xcf1   :  { %v927_v45 = vmul.f32 %v925_v47, %v908_v9 }
 0xcf3   :  { %929 = vrot.lane.b32.xlu1 %v927_v45, %s1605_s25 }
 0xd04   :  { %v862_v20 = vpop.permute.xlu1 %861 }
 0xd05   :  { %v864_v48 = vmul.f32 %v862_v20, %v845_v36 }
 0xd07   :  { %866 = vrot.lane.b32.xlu0 %v864_v48, %s1605_s25 }
 0xd65   :  { %v930_v49 = vpop.permute.xlu1 %929 }
 0xd66   :  { %1390 = vmatmul.msk.f32.vlgmr.msrb.gmra.mxu1 %vm198_vm6, %v930_v49  ;;  %1391 = vmatmul.msk.f32.vlgmr.msrb.gmra.mxu2 %vm198_vm6, %v930_v49 }
 0xd67   :  { %1237 = vmatpush.msrb.mxu1 %v1543_v37 }
 0xd69   :  { %1238 = vmatpush.msrb.mxu1 %v1544_v50 }
 0xd6b   :  { %1239 = vmatpush.msrb.mxu1 %v1707_v26  ;;  %v143_v26 = vadd.f32 %v1969_v23, %v142_v22 }
 0xd6d   :  { %1240 = vmatpush.msrb.mxu1 %v1719_v28 }
 0xd79   :  { %v867_v51 = vpop.permute.xlu0 %866 }
 0xd7a   :  { %1388 = vmatmul.msk.f32.vlgmr.msra.gmra.mxu3 %vm198_vm6, %v867_v51 }
 0xd7b   :  { %1174 = vmatpush.msra.mxu3 %v1768_v13 }
 0xd7d   :  { %1175 = vmatpush.msra.mxu3 %v1773_v14 }
 0xd7f   :  { %1176 = vmatpush.msra.mxu3 %v1780_v15 }
 0xd81   :  { %1177 = vmatpush.msra.mxu3 %v1786_v16 }
 0xde3   :  { %v950_v15 = vpop.f32.mrf.mxu1 }
 0xde9   :  { %v970_v28 = vpop.f32.mrf.mxu2 }
 0xdea   :  { %v1036_v24 = vadd.f32 %v970_v28, %v143_v26 }
 0xdec   :  { %1503 = vtanh.f32 %v1036_v24  ;;  %v1394_v52 = vmul.f32 -1.442695, %v1036_v24 }
 0xdf2   :  { %v1504_v25 = vpop.eup %1503 }
 0xdf3   :  { %1059 = vrot.lane.b32.xlu0 %v1504_v25, %s1603_s29 }
 0xdfd   :  { %v887_v13 = vpop.f32.mrf.mxu3 }
 0xdfe   :  { %v888_v14 = vadd.f32 %v1756_v34, %v887_v13 }
 0xe00   :  { %v973_v27 = vadd.f32 %v950_v15, %v888_v14 }
 0xe02   :  { %1505 = vtanh.f32 %v973_v27  ;;  %v1392_v29 = vmul.f32 -1.442695, %v973_v27 }
 0xe04   :  { %1507 = vpow2.f32 %v1392_v29 }
 0xe05   :  { %1509 = vpow2.f32 %v1394_v52 }
 0xe08   :  { %v1506_v16 = vpop.eup %1505 }
 0xe09   :  { %996 = vrot.lane.b32.xlu2 %v1506_v16, %s1603_s29 }
 0xe0a   :  { %v1508_v53 = vpop.eup %1507 }
 0xe0b   :  { %v1510_v54 = vpop.eup %1509  ;;  %v977_v55 = vadd.f32 1.0, %v1508_v53 }
 0xe0c   :  { %v1040_v56 = vadd.f32 1.0, %v1510_v54 }
 0xe0d   :  { %1511 = vrcp.f32 %v977_v55  ;;  %v989_v0 = vand.u32 2147483648, %v977_v55  ;;  %vm983_vm5 = vweird.f32 %v977_v55  ;;  %v987_v1 = vand.u32 2147483647, %v977_v55 }
 0xe0e   :  { %1513 = vrcp.f32 %v1040_v56  ;;  %v1052_v4 = vand.u32 2147483648, %v1040_v56  ;;  %vm1046_vm9 = vweird.f32 %v1040_v56  ;;  %v1050_v6 = vand.u32 2147483647, %v1040_v56 }
 0xe0f   :  { %v990_v7 = vor.u32 1.1754944e-38, %v989_v0  ;;  %vm988_vm11 = vcmp.eq.f32.partialorder %v987_v1, 8.507059e+37 }
 0xe10   :  { %v1053_v11 = vor.u32 1.1754944e-38, %v1052_v4  ;;  %vm1051_vm12 = vcmp.eq.f32.partialorder %v1050_v6, 8.507059e+37 }
 0xe13   :  { %v1512_v57 = vpop.eup %1511 }
 0xe14   :  { %v1514_v58 = vpop.eup %1513  ;;  %v979_v2 = vmul.f32 %v1512_v57, %v977_v55  ;;  %vm984_vm4 = vweird.f32 %v1512_v57 }
 0xe15   :  { %v1042_v34 = vmul.f32 %v1514_v58, %v1040_v56  ;;  %vm1047_vm7 = vweird.f32 %v1514_v58  ;;  %vm985_vm8 = vmor %vm983_vm5, %vm984_vm4 }
 0xe16   :  { %v980_v59 = vsub.f32 1.0, %v979_v2  ;;  %vm1048_vm10 = vmor %vm1046_vm9, %vm1047_vm7 }
 0xe17   :  { %v1043_v60 = vsub.f32 1.0, %v1042_v34 }
 0xe18   :  { %v981_v61 = vmul.f32 %v1512_v57, %v980_v59 }
 0xe19   :  { %v1044_v62 = vmul.f32 %v1514_v58, %v1043_v60 }
 0xe1a   :  { %v982_v63 = vadd.f32 %v1512_v57, %v981_v61 }
 0xe1b   :  { %v1045_v3 = vadd.f32 %v1514_v58, %v1044_v62 }
 0xe1c   :  { %v986_v5 = vsel %vm985_vm8, %v1512_v57, %v982_v63 }
 0xe1d   :  { %v1049_v8 = vsel %vm1048_vm10, %v1514_v58, %v1045_v3  ;;  %v991_v10 = vsel %vm988_vm11, %v990_v7, %v986_v5 }
 0xe1e   :  { %v1054_v18 = vsel %vm1051_vm12, %v1053_v11, %v1049_v8  ;;  %v994_v36 = vmul.f32 %v991_v10, %v1936_v41  ;;  %v72_v41 = vld [vmem:[%s2041_s0 + $0x38] sm:$0xff] }
 0xe1f   :  { %v1057_v30 = vmul.f32 %v1054_v18, %v1940_v44  ;;  %1363 = vmatmul.msk.f32.gmra.mxu0 %vm78_vm1, %v72_v41 }
 0xe63   :  { %v997_v9 = vpop.permute.xlu2 %996 }
 0xe64   :  { %v999_v12 = vmul.f32 %v997_v9, %v991_v10 }
 0xe65   :  { %v1060_v17 = vpop.permute.xlu0 %1059 }
 0xe66   :  { %v1062_v19 = vmul.f32 %v1060_v17, %v1054_v18  ;;  %1001 = vrot.lane.b32.xlu1 %v999_v12, %s1605_s25 }
 0xe68   :  { %1064 = vrot.lane.b32.xlu2 %v1062_v19, %s1605_s25 }
 0xe9c   :  { %v145_v45 = vpop.f32.mrf.mxu0 }
 0xe9d   :  { %v146_v20 = vadd.f32 %v1969_v23, %v145_v45 }
 0xec2   :  { %v1065_v31 = vpop.permute.xlu2 %1064 }
 0xec3   :  { %v1978_v32 = vadd.f32 %v1065_v31, %v1057_v30 }
 0xec5   :  { %1515 = vtanh.f32 %v1978_v32 }
 0xecb   :  { %v1516_v35 = vpop.eup %1515 }
 0xecc   :  { %1070 = vrot.lane.b32.xlu1 %v1516_v35, %s1603_s29 }
 0xed8   :  { %v1002_v38 = vpop.permute.xlu1 %1001 }
 0xed9   :  { %v1983_v39 = vadd.f32 %v1002_v38, %v994_v36 }
 0xedb   :  { %1517 = vtanh.f32 %v1983_v39 }
 0xee1   :  { %v1518_v40 = vpop.eup %1517 }
 0xee2   :  { %1007 = vrot.lane.b32.xlu0 %v1518_v40, %s1603_s29 }
 0xf3e   :  { %v1071_v42 = vpop.permute.xlu1 %1070 }
 0xf3f   :  { %v1073_v43 = vmul.f32 %v1071_v42, %v1054_v18 }
 0xf41   :  { %1075 = vrot.lane.b32.xlu0 %v1073_v43, %s1605_s25 }
 0xf54   :  { %v1008_v44 = vpop.permute.xlu0 %1007 }
 0xf55   :  { %v1010_v33 = vmul.f32 %v1008_v44, %v991_v10 }
 0xf57   :  { %1012 = vrot.lane.b32.xlu2 %v1010_v33, %s1605_s25 }
 0xfb1   :  { %v1013_v46 = vpop.permute.xlu2 %1012 }
 0xfb2   :  { %1393 = vmatmul.msk.f32.vlgmr.msrb.gmra.mxu3 %vm198_vm6, %v1013_v46 }
 0xfb3   :  { %v1076_v47 = vpop.permute.xlu0 %1075 }
 0xfb4   :  { %1395 = vmatmul.msk.f32.vlgmr.msra.gmra.mxu1 %vm198_vm6, %v1076_v47  ;;  %1396 = vmatmul.msk.f32.vlgmr.msra.gmra.mxu2 %vm198_vm6, %v1076_v47 }
0x1031   :  { %v1096_v37 = vpop.f32.mrf.mxu1 }
0x1035   :  { %v1033_v48 = vpop.f32.mrf.mxu3 }
0x1036   :  { %v1034_v49 = vadd.f32 %v2000_v21, %v1033_v48 }
0x1037   :  { %v1116_v50 = vpop.f32.mrf.mxu2 }
0x1038   :  { %v1119_v51 = vadd.f32 %v1096_v37, %v1034_v49  ;;  %v1182_v22 = vadd.f32 %v1116_v50, %v146_v20 }
0x103a   :  { %1519 = vtanh.f32 %v1119_v51  ;;  %v1399_v23 = vmul.f32 -1.442695, %v1182_v22  ;;  %v1397_v14 = vmul.f32 -1.442695, %v1119_v51 }
0x103b   :  { %1521 = vtanh.f32 %v1182_v22 }
0x103c   :  { %1523 = vpow2.f32 %v1399_v23 }
0x1040   :  { %v1520_v26 = vpop.eup %1519 }
0x1041   :  { %v1522_v28 = vpop.eup %1521  ;;  %1142 = vrot.lane.b32.xlu1 %v1520_v26, %s1603_s29 }
0x1042   :  { %1205 = vrot.lane.b32.xlu2 %v1522_v28, %s1603_s29  ;;  %v1524_v24 = vpop.eup %1523 }
0x1043   :  { %v1186_v25 = vadd.f32 1.0, %v1524_v24 }
0x1045   :  { %1525 = vrcp.f32 %v1186_v25  ;;  %v1198_v54 = vand.u32 2147483648, %v1186_v25  ;;  %vm1192_vm14 = vweird.f32 %v1186_v25  ;;  %v1196_v55 = vand.u32 2147483647, %v1186_v25 }
0x1046   :  { %1527 = vpow2.f32 %v1397_v14  ;;  %v1286_v14 = vld [vmem:[#allocation2 + $0x18] sm:$0xff] }
0x1047   :  { %v1199_v57 = vor.u32 1.1754944e-38, %v1198_v54  ;;  %vm1197_vm0 = vcmp.eq.f32.partialorder %v1196_v55, 8.507059e+37  ;;  %1308 = vmatpush.msrb.mxu2 %v1286_v14  ;;  %v1319_v54 = vld [vmem:[%s2049_s8 + $0x10] sm:$0xff] }
0x104b   :  { %v1526_v13 = vpop.eup %1525 }
0x104c   :  { %v1188_v15 = vmul.f32 %v1526_v13, %v1186_v25  ;;  %v1528_v16 = vpop.eup %1527  ;;  %vm1193_vm13 = vweird.f32 %v1526_v13 }
0x104d   :  { %v1123_v52 = vadd.f32 1.0, %v1528_v16  ;;  %vm1194_vm15 = vmor %vm1192_vm14, %vm1193_vm13  ;;  %v1283_v16 = vld [vmem:[#allocation2] sm:$0xff] }
0x104e   :  { %v1189_v27 = vsub.f32 1.0, %v1188_v15  ;;  %v1285_v15 = vld [vmem:[#allocation2 + $0x10] sm:$0xff] }
0x104f   :  { %1529 = vrcp.f32 %v1123_v52  ;;  %v1135_v0 = vand.u32 2147483648, %v1123_v52  ;;  %vm1129_vm3 = vweird.f32 %v1123_v52  ;;  %v1133_v1 = vand.u32 2147483647, %v1123_v52  ;;  %1309 = vmatpush.msrb.mxu2 %v1285_v15 }
0x1050   :  { %v1190_v29 = vmul.f32 %v1526_v13, %v1189_v27  ;;  %v1284_v27 = vld [vmem:[#allocation2 + $0x8] sm:$0xff] }
0x1051   :  { %v1136_v4 = vor.u32 1.1754944e-38, %v1135_v0  ;;  %vm1134_vm5 = vcmp.eq.f32.partialorder %v1133_v1, 8.507059e+37  ;;  %1310 = vmatpush.msrb.mxu2 %v1284_v27 }
0x1052   :  { %v1191_v53 = vadd.f32 %v1526_v13, %v1190_v29 }
0x1053   :  { %1311 = vmatpush.msrb.mxu2 %v1283_v16 }
0x1054   :  { %v1195_v56 = vsel %vm1194_vm15, %v1526_v13, %v1191_v53  ;;  %v1320_v53 = vld [vmem:[%s2049_s8 + $0x18] sm:$0xff] }
0x1055   :  { %v1200_v2 = vsel %vm1197_vm0, %v1199_v57, %v1195_v56  ;;  %v1530_v34 = vpop.eup %1529  ;;  %1340 = vmatpush.msrb.mxu3 %v1320_v53  ;;  %v1318_v56 = vld [vmem:[%s2049_s8 + $0x8] sm:$0xff]  ;;  %v1317_v57 = vld [vmem:[%s2049_s8] sm:$0xff] }
0x1056   :  { %v1125_v60 = vmul.f32 %v1530_v34, %v1123_v52  ;;  %vm1130_vm2 = vweird.f32 %v1530_v34  ;;  %v1203_v8 = vmul.f32 %v1200_v2, %v1978_v32 }
0x1057   :  { %vm1131_vm4 = vmor %vm1129_vm3, %vm1130_vm2  ;;  %1341 = vmatpush.msrb.mxu3 %v1319_v54 }
0x1058   :  { %v1126_v61 = vsub.f32 1.0, %v1125_v60  ;;  %v1414_v60 = vld [vmem:[#allocation4] ss:$0 sm:$0xff] }
0x1059   :  { %1342 = vmatpush.msrb.mxu3 %v1318_v56 }
0x105a   :  { %v1127_v62 = vmul.f32 %v1530_v34, %v1126_v61 }
0x105b   :  { %1343 = vmatpush.msrb.mxu3 %v1317_v57 }
0x105c   :  { %v1128_v63 = vadd.f32 %v1530_v34, %v1127_v62 }
0x105e   :  { %v1132_v3 = vsel %vm1131_vm4, %v1530_v34, %v1128_v63 }
0x105f   :  { %v1137_v6 = vsel %vm1134_vm5, %v1136_v4, %v1132_v3 }
0x1060   :  { %v1140_v12 = vmul.f32 %v1137_v6, %v1983_v39 }
0x109c   :  { %v1206_v58 = vpop.permute.xlu2 %1205 }
0x109d   :  { %v1208_v59 = vmul.f32 %v1206_v58, %v1200_v2  ;;  %v1413_v58 = vld [vmem:[%s2048_s7] ss:$0 sm:$0xff] }
0x109f   :  { %1210 = vrot.lane.b32.xlu1 %v1208_v59, %s1605_s25 }
0x10b3   :  { %v1143_v5 = vpop.permute.xlu1 %1142 }
0x10b4   :  { %v1145_v7 = vmul.f32 %v1143_v5, %v1137_v6 }
0x10b6   :  { %1147 = vrot.lane.b32.xlu0 %v1145_v7, %s1605_s25 }
0x1111   :  { %v1211_v9 = vpop.permute.xlu1 %1210 }
0x1112   :  { %v1213_v10 = vadd.f32 %v1211_v9, %v1203_v8 }
0x1114   :  { %1531 = vtanh.f32 %v1213_v10 }
0x111a   :  { %v1532_v11 = vpop.eup %1531 }
0x111b   :  { %1216 = vrot.lane.b32.xlu0 %v1532_v11, %s1603_s29 }
0x1128   :  { %v1148_v17 = vpop.permute.xlu0 %1147 }
0x1129   :  { %v1150_v18 = vadd.f32 %v1148_v17, %v1140_v12 }
0x112b   :  { %1533 = vtanh.f32 %v1150_v18 }
0x1131   :  { %v1534_v19 = vpop.eup %1533 }
0x1132   :  { %1153 = vrot.lane.b32.xlu2 %v1534_v19, %s1603_s29 }
0x118c   :  { %v1154_v30 = vpop.permute.xlu2 %1153 }
0x118d   :  { %v1217_v31 = vpop.permute.xlu0 %1216  ;;  %v1156_v35 = vmul.f32 %v1154_v30, %v1137_v6 }
0x118e   :  { %v1219_v36 = vmul.f32 %v1217_v31, %v1200_v2 }
0x118f   :  { %1158 = vrot.lane.b32.xlu1 %v1156_v35, %s1605_s25 }
0x1190   :  { %1221 = vrot.lane.b32.xlu2 %v1219_v36, %s1605_s25 }
0x11ea   :  { %v1222_v32 = vpop.permute.xlu2 %1221 }
0x11eb   :  { %1400 = vmatmul.msk.f32.vlgmr.msrb.gmra.mxu1 %vm198_vm6, %v1222_v32 }
0x1201   :  { %v1159_v38 = vpop.permute.xlu1 %1158 }
0x1202   :  { %1398 = vmatmul.msk.f32.vlgmr.msra.gmra.mxu3 %vm198_vm6, %v1159_v38 }
0x1268   :  { %v1242_v42 = vpop.f32.mrf.mxu1 }
0x1285   :  { %v1179_v39 = vpop.f32.mrf.mxu3 }
0x1286   :  { %v1180_v40 = vadd.f32 %v2000_v21, %v1179_v39 }
0x1288   :  { %v1245_v43 = vadd.f32 %v1242_v42, %v1180_v40 }
0x128a   :  { %1535 = vtanh.f32 %v1245_v43  ;;  %v1401_v33 = vmul.f32 -1.442695, %v1245_v43 }
0x128c   :  { %1537 = vpow2.f32 %v1401_v33 }
0x1290   :  { %v1536_v44 = vpop.eup %1535 }
0x1291   :  { %1268 = vrot.lane.b32.xlu0 %v1536_v44, %s1603_s29 }
0x1292   :  { %v1538_v41 = vpop.eup %1537 }
0x1293   :  { %v1249_v46 = vadd.f32 1.0, %v1538_v41 }
0x1295   :  { %1539 = vrcp.f32 %v1249_v46  ;;  %v1261_v37 = vand.u32 2147483648, %v1249_v46  ;;  %vm1255_vm8 = vweird.f32 %v1249_v46  ;;  %v1259_v21 = vand.u32 2147483647, %v1249_v46 }
0x1297   :  { %v1262_v51 = vor.u32 1.1754944e-38, %v1261_v37  ;;  %vm1260_vm10 = vcmp.eq.f32.partialorder %v1259_v21, 8.507059e+37 }
0x129b   :  { %v1540_v47 = vpop.eup %1539 }
0x129c   :  { %v1251_v45 = vmul.f32 %v1540_v47, %v1249_v46  ;;  %vm1256_vm7 = vweird.f32 %v1540_v47 }
0x129d   :  { %vm1257_vm9 = vmor %vm1255_vm8, %vm1256_vm7 }
0x129e   :  { %v1252_v20 = vsub.f32 1.0, %v1251_v45 }
0x12a0   :  { %v1253_v48 = vmul.f32 %v1540_v47, %v1252_v20 }
0x12a2   :  { %v1254_v49 = vadd.f32 %v1540_v47, %v1253_v48 }
0x12a4   :  { %v1258_v50 = vsel %vm1257_vm9, %v1540_v47, %v1254_v49 }
0x12a5   :  { %v1263_v26 = vsel %vm1260_vm10, %v1262_v51, %v1258_v50 }
0x12a6   :  { %v1266_v23 = vmul.f32 %v1263_v26, %v1150_v18 }
0x1303   :  { %v1269_v22 = vpop.permute.xlu0 %1268 }
0x1304   :  { %v1271_v28 = vmul.f32 %v1269_v22, %v1263_v26 }
0x1306   :  { %1273 = vrot.lane.b32.xlu1 %v1271_v28, %s1605_s25 }
0x1378   :  { %v1274_v24 = vpop.permute.xlu1 %1273 }
0x1379   :  { %v1276_v25 = vadd.f32 %v1274_v24, %v1266_v23 }
0x137b   :  { %1541 = vtanh.f32 %v1276_v25 }
0x1381   :  { %v1542_v13 = vpop.eup %1541 }
0x1382   :  { %1279 = vrot.lane.b32.xlu2 %v1542_v13, %s1603_s29 }
0x13dc   :  { %v1280_v29 = vpop.permute.xlu2 %1279 }
0x13dd   :  { %v1282_v52 = vmul.f32 %v1280_v29, %v1263_v26 }
0x13df   :  { %1292 = vrot.lane.b32.xlu0 %v1282_v52, %s1605_s25 }
0x1451   :  { %v1293_v55 = vpop.permute.xlu0 %1292 }
0x1452   :  { %1402 = vmatmul.msk.f32.vlgmr.msrb.gmra.mxu2 %vm198_vm6, %v1293_v55 }
0x14d5   :  { %v1313_v2 = vpop.f32.mrf.mxu2 }
0x14d6   :  { %v1314_v34 = vadd.f32 %v1413_v58, %v1313_v2 }
0x14d8   :  { %v1316_v59 = vmax.f32 %v1314_v34, 0.0 }
0x14da   :  { %1403 = vmatmul.msk.f32.vlgmr.msrb.gmra.mxu3 %vm198_vm6, %v1316_v59 }
0x155d   :  { %v1345_v61 = vpop.f32.mrf.mxu3 }
0x155e   :  { %v1346_v62 = vadd.f32 %v1414_v60, %v1345_v61 }
0x1560   :  { %1348 = vst.msk [vmem:[%s2051_s10] sm:$0xff] %vm78_vm1, %v1346_v62 }
0x1561   :  { %1353 = vsyncpa [#allocation3], 1 }
0x1562   :  { %1354 = vsyncpa [#allocation5], 1 }

</bundles_post_ra>
